<compile_context>
chip_gen: v5e
topology: v5e:2x2
jax: 0.10.0
libtpu: 0.0.40
codegen_flags: <defaults>
</compile_context>

<pallas_src>
import functools

import jax
import jax.numpy as jnp
import numpy as np
from jax.experimental import pallas as pl
from jax.experimental.pallas import tpu as pltpu


# ----------------------------------------------------------------------------
# Fused Encoder kernel: LSTM stack (wavefront) + dense head + mu||std proj.
# ----------------------------------------------------------------------------
def _encoder_kernel(n_lstm, n_dense, *refs):
    # refs layout:
    #   x, (w_ih, w_hh, bias) * n_lstm, (w, b) * n_dense, w_ms, b_ms, out
    x_ref = refs[0]
    idx = 1
    lstm_refs = []
    for _ in range(n_lstm):
        lstm_refs.append((refs[idx], refs[idx + 1], refs[idx + 2]))
        idx += 3
    dense_refs = []
    for _ in range(n_dense):
        dense_refs.append((refs[idx], refs[idx + 1]))
        idx += 2
    wms_ref, bms_ref = refs[idx], refs[idx + 1]
    out_ref = refs[idx + 2]

    f32 = jnp.float32
    bf16 = jnp.bfloat16
    B, T, D = x_ref.shape
    H = lstm_refs[0][1].shape[0]          # w_hh is (H, 4H)

    # Weights resident as bf16 values, biases (b_ih + b_hh) as f32 rows.
    wih = [r[0][...] for r in lstm_refs]  # (D_l, 4H) bf16
    whh = [r[1][...] for r in lstm_refs]  # (H,   4H) bf16
    bias = [r[2][...] for r in lstm_refs]  # (1,   4H) f32

    # --- Layer 0: input contribution for all T steps in ONE MXU matmul. ---
    x_bf = x_ref[...].astype(bf16)                               # (B, T, D)
    gx0 = (jnp.dot(x_bf.reshape(B * T, D), wih[0],
                   preferred_element_type=f32)
           + bias[0]).reshape(B, T, 4 * H)
    # Per-step slices have no dependence on the recurrence -> off critical path.
    gx0_steps = [gx0[:, t, :] for t in range(T)]

    def lstm_cell(gates, c_prev):
        # PyTorch gate order i, f, g, o.  Full-width activations: 2 EUP pushes
        # on 128-lane vregs instead of 4 pushes on 32-lane slices.
        sg = jax.nn.sigmoid(gates)
        tg = jnp.tanh(gates)
        i_g = sg[:, 0 * H:1 * H]
        f_g = sg[:, 1 * H:2 * H]
        g_g = tg[:, 2 * H:3 * H]
        o_g = sg[:, 3 * H:4 * H]
        c_new = f_g * c_prev + i_g * g_g
        h_new = o_g * jnp.tanh(c_new)
        return h_new, c_new

    h = [jnp.zeros((B, H), f32) for _ in range(n_lstm)]
    c = [jnp.zeros((B, H), f32) for _ in range(n_lstm)]

    # --- Wavefront schedule: step s handles (layer l, time t = s - l). ---
    # Every read inside a wavefront step uses only values produced at step
    # s-1, so all matmuls issued within a step are mutually independent.
    # TODO(synk): for large T switch to lax.fori_loop(..., unroll=4..8) with a
    # (h, c) carry to bound vreg live ranges; full unroll is right at T=8.
    for s in range(T + n_lstm - 1):
        h_prev = list(h)                  # snapshot of end-of-step-(s-1) state
        for l in range(n_lstm):
            t = s - l
            if not (0 <= t < T):
                continue
            if l == 0:
                gin = gx0_steps[t]        # precomputed x @ W_ih + bias
            else:
                gin = (jnp.dot(h_prev[l - 1].astype(bf16), wih[l],
                               preferred_element_type=f32) + bias[l])
            gates = gin + jnp.dot(h_prev[l].astype(bf16), whh[l],
                                  preferred_element_type=f32)
            h[l], c[l] = lstm_cell(gates, c[l])

    # --- Dense + ReLU head on the last layer's final hidden state. ---
    x = h[n_lstm - 1]
    for (w_ref, bd_ref) in dense_refs:
        x = jnp.maximum(
            jnp.dot(x.astype(bf16), w_ref[...],
                    preferred_element_type=f32) + bd_ref[...], 0.0)

    # --- fc_mu and fc_std fused into one matmul + one wide store. ---
    out_ref[...] = (jnp.dot(x.astype(bf16), wms_ref[...],
                            preferred_element_type=f32)
                    + bms_ref[...]).astype(out_ref.dtype)


def _full_spec(shape):
    nd = len(shape)
    return pl.BlockSpec(tuple(shape), lambda i, nd=nd: (0,) * nd)


# ----------------------------------------------------------------------------
# One-time parameter packing: transposes, bias fusion, mu||std concat, bf16.
# Done ONCE at init so the forward path emits no extra XLA prep ops.
# ----------------------------------------------------------------------------
def pack_encoder_params(params, latent_dim):
    packed = {"lstm": [], "dense": [], "latent_dim": int(latent_dim)}
    for (w_ih, w_hh, b_ih, b_hh) in params["lstm"]:
        wih_t = jnp.asarray(w_ih, jnp.float32).T.astype(jnp.bfloat16)  # (D_l,4H)
        whh_t = jnp.asarray(w_hh, jnp.float32).T.astype(jnp.bfloat16)  # (H,  4H)
        bias = (jnp.asarray(b_ih, jnp.float32)
                + jnp.asarray(b_hh, jnp.float32)).reshape(1, -1)       # (1,  4H)
        packed["lstm"].append((wih_t, whh_t, bias))
    for (w, b) in params["dense"]:
        packed["dense"].append(
            (jnp.asarray(w, jnp.float32).T.astype(jnp.bfloat16),
             jnp.asarray(b, jnp.float32).reshape(1, -1)))
    w_ms = jnp.concatenate(
        [jnp.asarray(params["fc_mu"][0], jnp.float32).T,
         jnp.asarray(params["fc_std"][0], jnp.float32).T],
        axis=1).astype(jnp.bfloat16)                                   # (d_in, 2L)
    b_ms = jnp.concatenate(
        [jnp.asarray(params["fc_mu"][1], jnp.float32),
         jnp.asarray(params["fc_std"][1], jnp.float32)]).reshape(1, -1)
    packed["fc_mustd"] = (w_ms, b_ms)
    return jax.tree_util.tree_map(lambda a: a, packed)


# ----------------------------------------------------------------------------
# Encoder forward: one fused pallas_call over pre-packed parameters.
# ----------------------------------------------------------------------------
def encoder_forward_pallas(x_btd, packed):
    """x_btd: (B, T, pose_dim) batch-first, as in the PyTorch module."""
    x_btd = jnp.asarray(x_btd, jnp.float32)
    B, T, D = x_btd.shape
    latent_dim = packed["latent_dim"]
    n_lstm = len(packed["lstm"])
    n_dense = len(packed["dense"])

    args = [x_btd]
    in_specs = [_full_spec((B, T, D))]
    for triple in packed["lstm"]:
        for a in triple:
            args.append(a)
            in_specs.append(_full_spec(a.shape))
    for pair in packed["dense"]:
        for a in pair:
            args.append(a)
            in_specs.append(_full_spec(a.shape))
    w_ms, b_ms = packed["fc_mustd"]
    args += [w_ms, b_ms]
    in_specs += [_full_spec(w_ms.shape), _full_spec(b_ms.shape)]

    out = pl.pallas_call(
        functools.partial(_encoder_kernel, n_lstm, n_dense),
        out_shape=jax.ShapeDtypeStruct((B, 2 * latent_dim), jnp.float32),
        grid_spec=pltpu.PrefetchScalarGridSpec(
            num_scalar_prefetch=0,
            grid=(1,),
            in_specs=in_specs,
            out_specs=_full_spec((B, 2 * latent_dim)),
        ),
        compiler_params=pltpu.CompilerParams(
            dimension_semantics=("arbitrary",)),
    )(*args)

    # TODO(synk): on v7x with non-trivial batch, add a leading "parallel"
    # batch-block grid axis so both TensorCores share the work; and when
    # scaling B*T*H, chunk the gx precompute over T and set vmem_limit_bytes.
    return out[:, :latent_dim], out[:, latent_dim:]


# ----------------------------------------------------------------------------
# Parameter init (matches torch nn.LSTM / nn.Linear layouts).
# ----------------------------------------------------------------------------
def init_encoder_params(key, pose_dim, rnn_layer_count, rnn_layer_size,
                        dense_layer_sizes, latent_dim):
    params = {"lstm": [], "dense": []}
    H = rnn_layer_size
    k_bound = 1.0 / np.sqrt(H)

    def uni(key, shape, bound):
        return jax.random.uniform(key, shape, jnp.float32, -bound, bound)

    for layer in range(rnn_layer_count):
        d_in = pose_dim if layer == 0 else H
        key, k1, k2, k3, k4 = jax.random.split(key, 5)
        w_ih = uni(k1, (4 * H, d_in), k_bound)     # torch layout (4H, D)
        w_hh = uni(k2, (4 * H, H), k_bound)
        b_ih = uni(k3, (4 * H,), k_bound)
        b_hh = uni(k4, (4 * H,), k_bound)
        params["lstm"].append((w_ih, w_hh, b_ih, b_hh))

    sizes = [rnn_layer_size] + list(dense_layer_sizes)
    for li in range(len(dense_layer_sizes)):
        d_in, d_out = sizes[li], sizes[li + 1]
        bound = 1.0 / np.sqrt(d_in)
        key, k1, k2 = jax.random.split(key, 3)
        w = uni(k1, (d_out, d_in), bound)          # torch layout (out, in)
        b = uni(k2, (d_out,), bound)
        params["dense"].append((w, b))

    d_in = dense_layer_sizes[-1]
    bound = 1.0 / np.sqrt(d_in)
    key, k1, k2, k3, k4 = jax.random.split(key, 5)
    params["fc_mu"] = (uni(k1, (latent_dim, d_in), bound),
                       uni(k2, (latent_dim,), bound))
    params["fc_std"] = (uni(k3, (latent_dim, d_in), bound),
                        uni(k4, (latent_dim,), bound))
    return params


# ----------------------------------------------------------------------------
# Pure-JAX f32 reference (for correctness check).
# ----------------------------------------------------------------------------
def encoder_forward_ref(x_btd, params, latent_dim):
    h_seq = x_btd.astype(jnp.float32)
    for (w_ih, w_hh, b_ih, b_hh) in params["lstm"]:
        B = h_seq.shape[0]
        H = w_hh.shape[1]

        def step(carry, x_t, w_ih=w_ih, w_hh=w_hh, b_ih=b_ih, b_hh=b_hh):
            h, c = carry
            gates = x_t @ w_ih.T + h @ w_hh.T + b_ih + b_hh
            i, f, g, o = jnp.split(gates, 4, axis=-1)
            c = jax.nn.sigmoid(f) * c + jax.nn.sigmoid(i) * jnp.tanh(g)
            h = jax.nn.sigmoid(o) * jnp.tanh(c)
            return (h, c), h

        init = (jnp.zeros((B, H), jnp.float32), jnp.zeros((B, H), jnp.float32))
        (_, _), hs = jax.lax.scan(step, init, jnp.swapaxes(h_seq, 0, 1))
        h_seq = jnp.swapaxes(hs, 0, 1)

    x = h_seq[:, -1, :]
    for (w, b) in params["dense"]:
        x = jax.nn.relu(x @ w.T + b)
    mu = x @ params["fc_mu"][0].T + params["fc_mu"][1]
    std = x @ params["fc_std"][0].T + params["fc_std"][1]
    return mu, std


# ----------------------------------------------------------------------------
if __name__ == "__main__":
    # Small shapes consistent with the module's forward:
    batch = 2
    sequence_length = 8
    joint_count, joint_dim = 4, 3
    pose_dim = joint_count * joint_dim       # 12
    rnn_layer_count = 2
    rnn_layer_size = 32
    dense_layer_sizes = [32, 24]
    latent_dim = 16

    key = jax.random.PRNGKey(0)
    key, kx, kp = jax.random.split(key, 3)
    x = jax.random.normal(kx, (batch, sequence_length, pose_dim), jnp.float32)

    params = init_encoder_params(kp, pose_dim, rnn_layer_count,
                                 rnn_layer_size, dense_layer_sizes, latent_dim)

    # One-time packing (transposes / bias fusion / mu||std concat / bf16 cast).
    packed = pack_encoder_params(params, latent_dim)

    fwd = jax.jit(lambda xb: encoder_forward_pallas(xb, packed))
    mu, std = fwd(x)
    mu, std = jax.block_until_ready((mu, std))

    mu_ref, std_ref = encoder_forward_ref(x, params, latent_dim)
    # bf16 MXU operands with f32 accumulation -> loose tolerance vs f32 ref.
    np.testing.assert_allclose(np.asarray(mu), np.asarray(mu_ref),
                               rtol=5e-2, atol=5e-2)
    np.testing.assert_allclose(np.asarray(std), np.asarray(std_ref),
                               rtol=5e-2, atol=5e-2)

    print("KERNEL_OK")
</pallas_src>

<mosaic_0001>
module attributes {stable_mosaic.version = 11 : i64} {
  func.func @_encoder_kernel(%arg0: i32, %arg1: memref<2x8x12xf32, #tpu.memory_space<vmem>>, %arg2: memref<12x128xbf16, #tpu.memory_space<vmem>>, %arg3: memref<32x128xbf16, #tpu.memory_space<vmem>>, %arg4: memref<1x128xf32, #tpu.memory_space<vmem>>, %arg5: memref<32x128xbf16, #tpu.memory_space<vmem>>, %arg6: memref<32x128xbf16, #tpu.memory_space<vmem>>, %arg7: memref<1x128xf32, #tpu.memory_space<vmem>>, %arg8: memref<32x32xbf16, #tpu.memory_space<vmem>>, %arg9: memref<1x32xf32, #tpu.memory_space<vmem>>, %arg10: memref<32x24xbf16, #tpu.memory_space<vmem>>, %arg11: memref<1x24xf32, #tpu.memory_space<vmem>>, %arg12: memref<24x32xbf16, #tpu.memory_space<vmem>>, %arg13: memref<1x32xf32, #tpu.memory_space<vmem>>, %arg14: memref<2x32xf32, #tpu.memory_space<vmem>>) attributes {dimension_semantics = [#tpu.dimension_semantics<arbitrary>], iteration_bounds = array<i64: 1>, scalar_prefetch = 0 : i64, scratch_operands = 0 : i64, tpu.core_type = #tpu.core_type<tc>, window_params = [{pipeline_mode = #tpu.pipeline_mode<synchronous>, transform_indices = @transform_0, window_bounds = array<i64: 2, 8, 12>}, {pipeline_mode = #tpu.pipeline_mode<synchronous>, transform_indices = @transform_1, window_bounds = array<i64: 12, 128>}, {pipeline_mode = #tpu.pipeline_mode<synchronous>, transform_indices = @transform_2, window_bounds = array<i64: 32, 128>}, {pipeline_mode = #tpu.pipeline_mode<synchronous>, transform_indices = @transform_3, window_bounds = array<i64: 1, 128>}, {pipeline_mode = #tpu.pipeline_mode<synchronous>, transform_indices = @transform_4, window_bounds = array<i64: 32, 128>}, {pipeline_mode = #tpu.pipeline_mode<synchronous>, transform_indices = @transform_5, window_bounds = array<i64: 32, 128>}, {pipeline_mode = #tpu.pipeline_mode<synchronous>, transform_indices = @transform_6, window_bounds = array<i64: 1, 128>}, {pipeline_mode = #tpu.pipeline_mode<synchronous>, transform_indices = @transform_7, window_bounds = array<i64: 32, 32>}, {pipeline_mode = #tpu.pipeline_mode<synchronous>, transform_indices = @transform_8, window_bounds = array<i64: 1, 32>}, {pipeline_mode = #tpu.pipeline_mode<synchronous>, transform_indices = @transform_9, window_bounds = array<i64: 32, 24>}, {pipeline_mode = #tpu.pipeline_mode<synchronous>, transform_indices = @transform_10, window_bounds = array<i64: 1, 24>}, {pipeline_mode = #tpu.pipeline_mode<synchronous>, transform_indices = @transform_11, window_bounds = array<i64: 24, 32>}, {pipeline_mode = #tpu.pipeline_mode<synchronous>, transform_indices = @transform_12, window_bounds = array<i64: 1, 32>}, {pipeline_mode = #tpu.pipeline_mode<synchronous>, transform_indices = @transform_13, window_bounds = array<i64: 2, 32>}]} {
    %c0 = arith.constant 0 : index
    %c0_0 = arith.constant 0 : index
    %0 = vector.load %arg2[%c0, %c0_0] : memref<12x128xbf16, #tpu.memory_space<vmem>>, vector<12x128xbf16>
    %c0_1 = arith.constant 0 : index
    %c0_2 = arith.constant 0 : index
    %1 = vector.load %arg5[%c0_1, %c0_2] : memref<32x128xbf16, #tpu.memory_space<vmem>>, vector<32x128xbf16>
    %c0_3 = arith.constant 0 : index
    %c0_4 = arith.constant 0 : index
    %2 = vector.load %arg3[%c0_3, %c0_4] : memref<32x128xbf16, #tpu.memory_space<vmem>>, vector<32x128xbf16>
    %c0_5 = arith.constant 0 : index
    %c0_6 = arith.constant 0 : index
    %3 = vector.load %arg6[%c0_5, %c0_6] : memref<32x128xbf16, #tpu.memory_space<vmem>>, vector<32x128xbf16>
    %c0_7 = arith.constant 0 : index
    %c0_8 = arith.constant 0 : index
    %4 = vector.load %arg4[%c0_7, %c0_8] : memref<1x128xf32, #tpu.memory_space<vmem>>, vector<1x128xf32>
    %c0_9 = arith.constant 0 : index
    %c0_10 = arith.constant 0 : index
    %5 = vector.load %arg7[%c0_9, %c0_10] : memref<1x128xf32, #tpu.memory_space<vmem>>, vector<1x128xf32>
    %c0_11 = arith.constant 0 : index
    %c0_12 = arith.constant 0 : index
    %c0_13 = arith.constant 0 : index
    %6 = vector.load %arg1[%c0_11, %c0_12, %c0_13] : memref<2x8x12xf32, #tpu.memory_space<vmem>>, vector<2x8x12xf32>
    %7 = arith.truncf %6 : vector<2x8x12xf32> to vector<2x8x12xbf16>
    %8 = vector.shape_cast %7 : vector<2x8x12xbf16> to vector<16x12xbf16>
    %cst = arith.constant dense<0.000000e+00> : vector<16x128xf32>
    %9 = tpu.matmul %8, %0, %cst {dimension_numbers = #tpu.dot_dimension_numbers<[1], [0], [0], [1], [0, 0, 1, 1], [], []>} : vector<16x12xbf16>, vector<12x128xbf16>, vector<16x128xf32> -> vector<16x128xf32>
    %10 = vector.broadcast %4 : vector<1x128xf32> to vector<16x128xf32>
    %11 = arith.addf %9, %10 : vector<16x128xf32>
    %12 = vector.shape_cast %11 : vector<16x128xf32> to vector<2x8x128xf32>
    %13 = vector.extract_strided_slice %12 {offsets = [0, 0, 0], sizes = [2, 1, 128], strides = [1, 1, 1]} : vector<2x8x128xf32> to vector<2x1x128xf32>
    %14 = vector.shape_cast %13 : vector<2x1x128xf32> to vector<2x128xf32>
    %15 = vector.extract_strided_slice %12 {offsets = [0, 1, 0], sizes = [2, 1, 128], strides = [1, 1, 1]} : vector<2x8x128xf32> to vector<2x1x128xf32>
    %16 = vector.shape_cast %15 : vector<2x1x128xf32> to vector<2x128xf32>
    %17 = vector.extract_strided_slice %12 {offsets = [0, 2, 0], sizes = [2, 1, 128], strides = [1, 1, 1]} : vector<2x8x128xf32> to vector<2x1x128xf32>
    %18 = vector.shape_cast %17 : vector<2x1x128xf32> to vector<2x128xf32>
    %19 = vector.extract_strided_slice %12 {offsets = [0, 3, 0], sizes = [2, 1, 128], strides = [1, 1, 1]} : vector<2x8x128xf32> to vector<2x1x128xf32>
    %20 = vector.shape_cast %19 : vector<2x1x128xf32> to vector<2x128xf32>
    %21 = vector.extract_strided_slice %12 {offsets = [0, 4, 0], sizes = [2, 1, 128], strides = [1, 1, 1]} : vector<2x8x128xf32> to vector<2x1x128xf32>
    %22 = vector.shape_cast %21 : vector<2x1x128xf32> to vector<2x128xf32>
    %23 = vector.extract_strided_slice %12 {offsets = [0, 5, 0], sizes = [2, 1, 128], strides = [1, 1, 1]} : vector<2x8x128xf32> to vector<2x1x128xf32>
    %24 = vector.shape_cast %23 : vector<2x1x128xf32> to vector<2x128xf32>
    %25 = vector.extract_strided_slice %12 {offsets = [0, 6, 0], sizes = [2, 1, 128], strides = [1, 1, 1]} : vector<2x8x128xf32> to vector<2x1x128xf32>
    %26 = vector.shape_cast %25 : vector<2x1x128xf32> to vector<2x128xf32>
    %27 = vector.extract_strided_slice %12 {offsets = [0, 7, 0], sizes = [2, 1, 128], strides = [1, 1, 1]} : vector<2x8x128xf32> to vector<2x1x128xf32>
    %28 = vector.shape_cast %27 : vector<2x1x128xf32> to vector<2x128xf32>
    %cst_14 = arith.constant 0.000000e+00 : f32
    %29 = vector.broadcast %cst_14 : f32 to vector<2x32xf32>
    %cst_15 = arith.constant 0.000000e+00 : f32
    %30 = vector.broadcast %cst_15 : f32 to vector<2x32xf32>
    %cst_16 = arith.constant 0.000000e+00 : f32
    %31 = vector.broadcast %cst_16 : f32 to vector<2x32xf32>
    %cst_17 = arith.constant 0.000000e+00 : f32
    %32 = vector.broadcast %cst_17 : f32 to vector<2x32xf32>
    %33 = arith.truncf %29 : vector<2x32xf32> to vector<2x32xbf16>
    %cst_18 = arith.constant dense<0.000000e+00> : vector<2x128xf32>
    %34 = tpu.matmul %33, %2, %cst_18 {dimension_numbers = #tpu.dot_dimension_numbers<[1], [0], [0], [1], [0, 0, 1, 1], [], []>} : vector<2x32xbf16>, vector<32x128xbf16>, vector<2x128xf32> -> vector<2x128xf32>
    %35 = arith.addf %14, %34 : vector<2x128xf32>
    %36 = arith.negf %35 : vector<2x128xf32>
    %37 = math.exp %36 : vector<2x128xf32>
    %cst_19 = arith.constant 1.000000e+00 : f32
    %38 = vector.broadcast %cst_19 : f32 to vector<2x128xf32>
    %39 = arith.addf %38, %37 : vector<2x128xf32>
    %40 = arith.divf %38, %39 : vector<2x128xf32>
    %41 = math.tanh %35 : vector<2x128xf32>
    %42 = vector.extract_strided_slice %40 {offsets = [0, 0], sizes = [2, 32], strides = [1, 1]} : vector<2x128xf32> to vector<2x32xf32>
    %43 = vector.extract_strided_slice %40 {offsets = [0, 32], sizes = [2, 32], strides = [1, 1]} : vector<2x128xf32> to vector<2x32xf32>
    %44 = vector.extract_strided_slice %41 {offsets = [0, 64], sizes = [2, 32], strides = [1, 1]} : vector<2x128xf32> to vector<2x32xf32>
    %45 = vector.extract_strided_slice %40 {offsets = [0, 96], sizes = [2, 32], strides = [1, 1]} : vector<2x128xf32> to vector<2x32xf32>
    %46 = arith.mulf %43, %31 : vector<2x32xf32>
    %47 = arith.mulf %42, %44 : vector<2x32xf32>
    %48 = arith.addf %46, %47 : vector<2x32xf32>
    %49 = math.tanh %48 : vector<2x32xf32>
    %50 = arith.mulf %45, %49 : vector<2x32xf32>
    %51 = arith.truncf %50 : vector<2x32xf32> to vector<2x32xbf16>
    %cst_20 = arith.constant dense<0.000000e+00> : vector<2x128xf32>
    %52 = tpu.matmul %51, %2, %cst_20 {dimension_numbers = #tpu.dot_dimension_numbers<[1], [0], [0], [1], [0, 0, 1, 1], [], []>} : vector<2x32xbf16>, vector<32x128xbf16>, vector<2x128xf32> -> vector<2x128xf32>
    %53 = arith.addf %16, %52 : vector<2x128xf32>
    %54 = arith.negf %53 : vector<2x128xf32>
    %55 = math.exp %54 : vector<2x128xf32>
    %cst_21 = arith.constant 1.000000e+00 : f32
    %56 = vector.broadcast %cst_21 : f32 to vector<2x128xf32>
    %57 = arith.addf %56, %55 : vector<2x128xf32>
    %58 = arith.divf %56, %57 : vector<2x128xf32>
    %59 = math.tanh %53 : vector<2x128xf32>
    %60 = vector.extract_strided_slice %58 {offsets = [0, 0], sizes = [2, 32], strides = [1, 1]} : vector<2x128xf32> to vector<2x32xf32>
    %61 = vector.extract_strided_slice %58 {offsets = [0, 32], sizes = [2, 32], strides = [1, 1]} : vector<2x128xf32> to vector<2x32xf32>
    %62 = vector.extract_strided_slice %59 {offsets = [0, 64], sizes = [2, 32], strides = [1, 1]} : vector<2x128xf32> to vector<2x32xf32>
    %63 = vector.extract_strided_slice %58 {offsets = [0, 96], sizes = [2, 32], strides = [1, 1]} : vector<2x128xf32> to vector<2x32xf32>
    %64 = arith.mulf %61, %48 : vector<2x32xf32>
    %65 = arith.mulf %60, %62 : vector<2x32xf32>
    %66 = arith.addf %64, %65 : vector<2x32xf32>
    %67 = math.tanh %66 : vector<2x32xf32>
    %68 = arith.mulf %63, %67 : vector<2x32xf32>
    %69 = arith.truncf %50 : vector<2x32xf32> to vector<2x32xbf16>
    %cst_22 = arith.constant dense<0.000000e+00> : vector<2x128xf32>
    %70 = tpu.matmul %69, %1, %cst_22 {dimension_numbers = #tpu.dot_dimension_numbers<[1], [0], [0], [1], [0, 0, 1, 1], [], []>} : vector<2x32xbf16>, vector<32x128xbf16>, vector<2x128xf32> -> vector<2x128xf32>
    %71 = vector.broadcast %5 : vector<1x128xf32> to vector<2x128xf32>
    %72 = arith.addf %70, %71 : vector<2x128xf32>
    %73 = arith.truncf %30 : vector<2x32xf32> to vector<2x32xbf16>
    %cst_23 = arith.constant dense<0.000000e+00> : vector<2x128xf32>
    %74 = tpu.matmul %73, %3, %cst_23 {dimension_numbers = #tpu.dot_dimension_numbers<[1], [0], [0], [1], [0, 0, 1, 1], [], []>} : vector<2x32xbf16>, vector<32x128xbf16>, vector<2x128xf32> -> vector<2x128xf32>
    %75 = arith.addf %72, %74 : vector<2x128xf32>
    %76 = arith.negf %75 : vector<2x128xf32>
    %77 = math.exp %76 : vector<2x128xf32>
    %cst_24 = arith.constant 1.000000e+00 : f32
    %78 = vector.broadcast %cst_24 : f32 to vector<2x128xf32>
    %79 = arith.addf %78, %77 : vector<2x128xf32>
    %80 = arith.divf %78, %79 : vector<2x128xf32>
    %81 = math.tanh %75 : vector<2x128xf32>
    %82 = vector.extract_strided_slice %80 {offsets = [0, 0], sizes = [2, 32], strides = [1, 1]} : vector<2x128xf32> to vector<2x32xf32>
    %83 = vector.extract_strided_slice %80 {offsets = [0, 32], sizes = [2, 32], strides = [1, 1]} : vector<2x128xf32> to vector<2x32xf32>
    %84 = vector.extract_strided_slice %81 {offsets = [0, 64], sizes = [2, 32], strides = [1, 1]} : vector<2x128xf32> to vector<2x32xf32>
    %85 = vector.extract_strided_slice %80 {offsets = [0, 96], sizes = [2, 32], strides = [1, 1]} : vector<2x128xf32> to vector<2x32xf32>
    %86 = arith.mulf %83, %32 : vector<2x32xf32>
    %87 = arith.mulf %82, %84 : vector<2x32xf32>
    %88 = arith.addf %86, %87 : vector<2x32xf32>
    %89 = math.tanh %88 : vector<2x32xf32>
    %90 = arith.mulf %85, %89 : vector<2x32xf32>
    %91 = arith.truncf %68 : vector<2x32xf32> to vector<2x32xbf16>
    %cst_25 = arith.constant dense<0.000000e+00> : vector<2x128xf32>
    %92 = tpu.matmul %91, %2, %cst_25 {dimension_numbers = #tpu.dot_dimension_numbers<[1], [0], [0], [1], [0, 0, 1, 1], [], []>} : vector<2x32xbf16>, vector<32x128xbf16>, vector<2x128xf32> -> vector<2x128xf32>
    %93 = arith.addf %18, %92 : vector<2x128xf32>
    %94 = arith.negf %93 : vector<2x128xf32>
    %95 = math.exp %94 : vector<2x128xf32>
    %cst_26 = arith.constant 1.000000e+00 : f32
    %96 = vector.broadcast %cst_26 : f32 to vector<2x128xf32>
    %97 = arith.addf %96, %95 : vector<2x128xf32>
    %98 = arith.divf %96, %97 : vector<2x128xf32>
    %99 = math.tanh %93 : vector<2x128xf32>
    %100 = vector.extract_strided_slice %98 {offsets = [0, 0], sizes = [2, 32], strides = [1, 1]} : vector<2x128xf32> to vector<2x32xf32>
    %101 = vector.extract_strided_slice %98 {offsets = [0, 32], sizes = [2, 32], strides = [1, 1]} : vector<2x128xf32> to vector<2x32xf32>
    %102 = vector.extract_strided_slice %99 {offsets = [0, 64], sizes = [2, 32], strides = [1, 1]} : vector<2x128xf32> to vector<2x32xf32>
    %103 = vector.extract_strided_slice %98 {offsets = [0, 96], sizes = [2, 32], strides = [1, 1]} : vector<2x128xf32> to vector<2x32xf32>
    %104 = arith.mulf %101, %66 : vector<2x32xf32>
    %105 = arith.mulf %100, %102 : vector<2x32xf32>
    %106 = arith.addf %104, %105 : vector<2x32xf32>
    %107 = math.tanh %106 : vector<2x32xf32>
    %108 = arith.mulf %103, %107 : vector<2x32xf32>
    %109 = arith.truncf %68 : vector<2x32xf32> to vector<2x32xbf16>
    %cst_27 = arith.constant dense<0.000000e+00> : vector<2x128xf32>
    %110 = tpu.matmul %109, %1, %cst_27 {dimension_numbers = #tpu.dot_dimension_numbers<[1], [0], [0], [1], [0, 0, 1, 1], [], []>} : vector<2x32xbf16>, vector<32x128xbf16>, vector<2x128xf32> -> vector<2x128xf32>
    %111 = vector.broadcast %5 : vector<1x128xf32> to vector<2x128xf32>
    %112 = arith.addf %110, %111 : vector<2x128xf32>
    %113 = arith.truncf %90 : vector<2x32xf32> to vector<2x32xbf16>
    %cst_28 = arith.constant dense<0.000000e+00> : vector<2x128xf32>
    %114 = tpu.matmul %113, %3, %cst_28 {dimension_numbers = #tpu.dot_dimension_numbers<[1], [0], [0], [1], [0, 0, 1, 1], [], []>} : vector<2x32xbf16>, vector<32x128xbf16>, vector<2x128xf32> -> vector<2x128xf32>
    %115 = arith.addf %112, %114 : vector<2x128xf32>
    %116 = arith.negf %115 : vector<2x128xf32>
    %117 = math.exp %116 : vector<2x128xf32>
    %cst_29 = arith.constant 1.000000e+00 : f32
    %118 = vector.broadcast %cst_29 : f32 to vector<2x128xf32>
    %119 = arith.addf %118, %117 : vector<2x128xf32>
    %120 = arith.divf %118, %119 : vector<2x128xf32>
    %121 = math.tanh %115 : vector<2x128xf32>
    %122 = vector.extract_strided_slice %120 {offsets = [0, 0], sizes = [2, 32], strides = [1, 1]} : vector<2x128xf32> to vector<2x32xf32>
    %123 = vector.extract_strided_slice %120 {offsets = [0, 32], sizes = [2, 32], strides = [1, 1]} : vector<2x128xf32> to vector<2x32xf32>
    %124 = vector.extract_strided_slice %121 {offsets = [0, 64], sizes = [2, 32], strides = [1, 1]} : vector<2x128xf32> to vector<2x32xf32>
    %125 = vector.extract_strided_slice %120 {offsets = [0, 96], sizes = [2, 32], strides = [1, 1]} : vector<2x128xf32> to vector<2x32xf32>
    %126 = arith.mulf %123, %88 : vector<2x32xf32>
    %127 = arith.mulf %122, %124 : vector<2x32xf32>
    %128 = arith.addf %126, %127 : vector<2x32xf32>
    %129 = math.tanh %128 : vector<2x32xf32>
    %130 = arith.mulf %125, %129 : vector<2x32xf32>
    %131 = arith.truncf %108 : vector<2x32xf32> to vector<2x32xbf16>
    %cst_30 = arith.constant dense<0.000000e+00> : vector<2x128xf32>
    %132 = tpu.matmul %131, %2, %cst_30 {dimension_numbers = #tpu.dot_dimension_numbers<[1], [0], [0], [1], [0, 0, 1, 1], [], []>} : vector<2x32xbf16>, vector<32x128xbf16>, vector<2x128xf32> -> vector<2x128xf32>
    %133 = arith.addf %20, %132 : vector<2x128xf32>
    %134 = arith.negf %133 : vector<2x128xf32>
    %135 = math.exp %134 : vector<2x128xf32>
    %cst_31 = arith.constant 1.000000e+00 : f32
    %136 = vector.broadcast %cst_31 : f32 to vector<2x128xf32>
    %137 = arith.addf %136, %135 : vector<2x128xf32>
    %138 = arith.divf %136, %137 : vector<2x128xf32>
    %139 = math.tanh %133 : vector<2x128xf32>
    %140 = vector.extract_strided_slice %138 {offsets = [0, 0], sizes = [2, 32], strides = [1, 1]} : vector<2x128xf32> to vector<2x32xf32>
    %141 = vector.extract_strided_slice %138 {offsets = [0, 32], sizes = [2, 32], strides = [1, 1]} : vector<2x128xf32> to vector<2x32xf32>
    %142 = vector.extract_strided_slice %139 {offsets = [0, 64], sizes = [2, 32], strides = [1, 1]} : vector<2x128xf32> to vector<2x32xf32>
    %143 = vector.extract_strided_slice %138 {offsets = [0, 96], sizes = [2, 32], strides = [1, 1]} : vector<2x128xf32> to vector<2x32xf32>
    %144 = arith.mulf %141, %106 : vector<2x32xf32>
    %145 = arith.mulf %140, %142 : vector<2x32xf32>
    %146 = arith.addf %144, %145 : vector<2x32xf32>
    %147 = math.tanh %146 : vector<2x32xf32>
    %148 = arith.mulf %143, %147 : vector<2x32xf32>
    %149 = arith.truncf %108 : vector<2x32xf32> to vector<2x32xbf16>
    %cst_32 = arith.constant dense<0.000000e+00> : vector<2x128xf32>
    %150 = tpu.matmul %149, %1, %cst_32 {dimension_numbers = #tpu.dot_dimension_numbers<[1], [0], [0], [1], [0, 0, 1, 1], [], []>} : vector<2x32xbf16>, vector<32x128xbf16>, vector<2x128xf32> -> vector<2x128xf32>
    %151 = vector.broadcast %5 : vector<1x128xf32> to vector<2x128xf32>
    %152 = arith.addf %150, %151 : vector<2x128xf32>
    %153 = arith.truncf %130 : vector<2x32xf32> to vector<2x32xbf16>
    %cst_33 = arith.constant dense<0.000000e+00> : vector<2x128xf32>
    %154 = tpu.matmul %153, %3, %cst_33 {dimension_numbers = #tpu.dot_dimension_numbers<[1], [0], [0], [1], [0, 0, 1, 1], [], []>} : vector<2x32xbf16>, vector<32x128xbf16>, vector<2x128xf32> -> vector<2x128xf32>
    %155 = arith.addf %152, %154 : vector<2x128xf32>
    %156 = arith.negf %155 : vector<2x128xf32>
    %157 = math.exp %156 : vector<2x128xf32>
    %cst_34 = arith.constant 1.000000e+00 : f32
    %158 = vector.broadcast %cst_34 : f32 to vector<2x128xf32>
    %159 = arith.addf %158, %157 : vector<2x128xf32>
    %160 = arith.divf %158, %159 : vector<2x128xf32>
    %161 = math.tanh %155 : vector<2x128xf32>
    %162 = vector.extract_strided_slice %160 {offsets = [0, 0], sizes = [2, 32], strides = [1, 1]} : vector<2x128xf32> to vector<2x32xf32>
    %163 = vector.extract_strided_slice %160 {offsets = [0, 32], sizes = [2, 32], strides = [1, 1]} : vector<2x128xf32> to vector<2x32xf32>
    %164 = vector.extract_strided_slice %161 {offsets = [0, 64], sizes = [2, 32], strides = [1, 1]} : vector<2x128xf32> to vector<2x32xf32>
    %165 = vector.extract_strided_slice %160 {offsets = [0, 96], sizes = [2, 32], strides = [1, 1]} : vector<2x128xf32> to vector<2x32xf32>
    %166 = arith.mulf %163, %128 : vector<2x32xf32>
    %167 = arith.mulf %162, %164 : vector<2x32xf32>
    %168 = arith.addf %166, %167 : vector<2x32xf32>
    %169 = math.tanh %168 : vector<2x32xf32>
    %170 = arith.mulf %165, %169 : vector<2x32xf32>
    %171 = arith.truncf %148 : vector<2x32xf32> to vector<2x32xbf16>
    %cst_35 = arith.constant dense<0.000000e+00> : vector<2x128xf32>
    %172 = tpu.matmul %171, %2, %cst_35 {dimension_numbers = #tpu.dot_dimension_numbers<[1], [0], [0], [1], [0, 0, 1, 1], [], []>} : vector<2x32xbf16>, vector<32x128xbf16>, vector<2x128xf32> -> vector<2x128xf32>
    %173 = arith.addf %22, %172 : vector<2x128xf32>
    %174 = arith.negf %173 : vector<2x128xf32>
    %175 = math.exp %174 : vector<2x128xf32>
    %cst_36 = arith.constant 1.000000e+00 : f32
    %176 = vector.broadcast %cst_36 : f32 to vector<2x128xf32>
    %177 = arith.addf %176, %175 : vector<2x128xf32>
    %178 = arith.divf %176, %177 : vector<2x128xf32>
    %179 = math.tanh %173 : vector<2x128xf32>
    %180 = vector.extract_strided_slice %178 {offsets = [0, 0], sizes = [2, 32], strides = [1, 1]} : vector<2x128xf32> to vector<2x32xf32>
    %181 = vector.extract_strided_slice %178 {offsets = [0, 32], sizes = [2, 32], strides = [1, 1]} : vector<2x128xf32> to vector<2x32xf32>
    %182 = vector.extract_strided_slice %179 {offsets = [0, 64], sizes = [2, 32], strides = [1, 1]} : vector<2x128xf32> to vector<2x32xf32>
    %183 = vector.extract_strided_slice %178 {offsets = [0, 96], sizes = [2, 32], strides = [1, 1]} : vector<2x128xf32> to vector<2x32xf32>
    %184 = arith.mulf %181, %146 : vector<2x32xf32>
    %185 = arith.mulf %180, %182 : vector<2x32xf32>
    %186 = arith.addf %184, %185 : vector<2x32xf32>
    %187 = math.tanh %186 : vector<2x32xf32>
    %188 = arith.mulf %183, %187 : vector<2x32xf32>
    %189 = arith.truncf %148 : vector<2x32xf32> to vector<2x32xbf16>
    %cst_37 = arith.constant dense<0.000000e+00> : vector<2x128xf32>
    %190 = tpu.matmul %189, %1, %cst_37 {dimension_numbers = #tpu.dot_dimension_numbers<[1], [0], [0], [1], [0, 0, 1, 1], [], []>} : vector<2x32xbf16>, vector<32x128xbf16>, vector<2x128xf32> -> vector<2x128xf32>
    %191 = vector.broadcast %5 : vector<1x128xf32> to vector<2x128xf32>
    %192 = arith.addf %190, %191 : vector<2x128xf32>
    %193 = arith.truncf %170 : vector<2x32xf32> to vector<2x32xbf16>
    %cst_38 = arith.constant dense<0.000000e+00> : vector<2x128xf32>
    %194 = tpu.matmul %193, %3, %cst_38 {dimension_numbers = #tpu.dot_dimension_numbers<[1], [0], [0], [1], [0, 0, 1, 1], [], []>} : vector<2x32xbf16>, vector<32x128xbf16>, vector<2x128xf32> -> vector<2x128xf32>
    %195 = arith.addf %192, %194 : vector<2x128xf32>
    %196 = arith.negf %195 : vector<2x128xf32>
    %197 = math.exp %196 : vector<2x128xf32>
    %cst_39 = arith.constant 1.000000e+00 : f32
    %198 = vector.broadcast %cst_39 : f32 to vector<2x128xf32>
    %199 = arith.addf %198, %197 : vector<2x128xf32>
    %200 = arith.divf %198, %199 : vector<2x128xf32>
    %201 = math.tanh %195 : vector<2x128xf32>
    %202 = vector.extract_strided_slice %200 {offsets = [0, 0], sizes = [2, 32], strides = [1, 1]} : vector<2x128xf32> to vector<2x32xf32>
    %203 = vector.extract_strided_slice %200 {offsets = [0, 32], sizes = [2, 32], strides = [1, 1]} : vector<2x128xf32> to vector<2x32xf32>
    %204 = vector.extract_strided_slice %201 {offsets = [0, 64], sizes = [2, 32], strides = [1, 1]} : vector<2x128xf32> to vector<2x32xf32>
    %205 = vector.extract_strided_slice %200 {offsets = [0, 96], sizes = [2, 32], strides = [1, 1]} : vector<2x128xf32> to vector<2x32xf32>
    %206 = arith.mulf %203, %168 : vector<2x32xf32>
    %207 = arith.mulf %202, %204 : vector<2x32xf32>
    %208 = arith.addf %206, %207 : vector<2x32xf32>
    %209 = math.tanh %208 : vector<2x32xf32>
    %210 = arith.mulf %205, %209 : vector<2x32xf32>
    %211 = arith.truncf %188 : vector<2x32xf32> to vector<2x32xbf16>
    %cst_40 = arith.constant dense<0.000000e+00> : vector<2x128xf32>
    %212 = tpu.matmul %211, %2, %cst_40 {dimension_numbers = #tpu.dot_dimension_numbers<[1], [0], [0], [1], [0, 0, 1, 1], [], []>} : vector<2x32xbf16>, vector<32x128xbf16>, vector<2x128xf32> -> vector<2x128xf32>
    %213 = arith.addf %24, %212 : vector<2x128xf32>
    %214 = arith.negf %213 : vector<2x128xf32>
    %215 = math.exp %214 : vector<2x128xf32>
    %cst_41 = arith.constant 1.000000e+00 : f32
    %216 = vector.broadcast %cst_41 : f32 to vector<2x128xf32>
    %217 = arith.addf %216, %215 : vector<2x128xf32>
    %218 = arith.divf %216, %217 : vector<2x128xf32>
    %219 = math.tanh %213 : vector<2x128xf32>
    %220 = vector.extract_strided_slice %218 {offsets = [0, 0], sizes = [2, 32], strides = [1, 1]} : vector<2x128xf32> to vector<2x32xf32>
    %221 = vector.extract_strided_slice %218 {offsets = [0, 32], sizes = [2, 32], strides = [1, 1]} : vector<2x128xf32> to vector<2x32xf32>
    %222 = vector.extract_strided_slice %219 {offsets = [0, 64], sizes = [2, 32], strides = [1, 1]} : vector<2x128xf32> to vector<2x32xf32>
    %223 = vector.extract_strided_slice %218 {offsets = [0, 96], sizes = [2, 32], strides = [1, 1]} : vector<2x128xf32> to vector<2x32xf32>
    %224 = arith.mulf %221, %186 : vector<2x32xf32>
    %225 = arith.mulf %220, %222 : vector<2x32xf32>
    %226 = arith.addf %224, %225 : vector<2x32xf32>
    %227 = math.tanh %226 : vector<2x32xf32>
    %228 = arith.mulf %223, %227 : vector<2x32xf32>
    %229 = arith.truncf %188 : vector<2x32xf32> to vector<2x32xbf16>
    %cst_42 = arith.constant dense<0.000000e+00> : vector<2x128xf32>
    %230 = tpu.matmul %229, %1, %cst_42 {dimension_numbers = #tpu.dot_dimension_numbers<[1], [0], [0], [1], [0, 0, 1, 1], [], []>} : vector<2x32xbf16>, vector<32x128xbf16>, vector<2x128xf32> -> vector<2x128xf32>
    %231 = vector.broadcast %5 : vector<1x128xf32> to vector<2x128xf32>
    %232 = arith.addf %230, %231 : vector<2x128xf32>
    %233 = arith.truncf %210 : vector<2x32xf32> to vector<2x32xbf16>
    %cst_43 = arith.constant dense<0.000000e+00> : vector<2x128xf32>
    %234 = tpu.matmul %233, %3, %cst_43 {dimension_numbers = #tpu.dot_dimension_numbers<[1], [0], [0], [1], [0, 0, 1, 1], [], []>} : vector<2x32xbf16>, vector<32x128xbf16>, vector<2x128xf32> -> vector<2x128xf32>
    %235 = arith.addf %232, %234 : vector<2x128xf32>
    %236 = arith.negf %235 : vector<2x128xf32>
    %237 = math.exp %236 : vector<2x128xf32>
    %cst_44 = arith.constant 1.000000e+00 : f32
    %238 = vector.broadcast %cst_44 : f32 to vector<2x128xf32>
    %239 = arith.addf %238, %237 : vector<2x128xf32>
    %240 = arith.divf %238, %239 : vector<2x128xf32>
    %241 = math.tanh %235 : vector<2x128xf32>
    %242 = vector.extract_strided_slice %240 {offsets = [0, 0], sizes = [2, 32], strides = [1, 1]} : vector<2x128xf32> to vector<2x32xf32>
    %243 = vector.extract_strided_slice %240 {offsets = [0, 32], sizes = [2, 32], strides = [1, 1]} : vector<2x128xf32> to vector<2x32xf32>
    %244 = vector.extract_strided_slice %241 {offsets = [0, 64], sizes = [2, 32], strides = [1, 1]} : vector<2x128xf32> to vector<2x32xf32>
    %245 = vector.extract_strided_slice %240 {offsets = [0, 96], sizes = [2, 32], strides = [1, 1]} : vector<2x128xf32> to vector<2x32xf32>
    %246 = arith.mulf %243, %208 : vector<2x32xf32>
    %247 = arith.mulf %242, %244 : vector<2x32xf32>
    %248 = arith.addf %246, %247 : vector<2x32xf32>
    %249 = math.tanh %248 : vector<2x32xf32>
    %250 = arith.mulf %245, %249 : vector<2x32xf32>
    %251 = arith.truncf %228 : vector<2x32xf32> to vector<2x32xbf16>
    %cst_45 = arith.constant dense<0.000000e+00> : vector<2x128xf32>
    %252 = tpu.matmul %251, %2, %cst_45 {dimension_numbers = #tpu.dot_dimension_numbers<[1], [0], [0], [1], [0, 0, 1, 1], [], []>} : vector<2x32xbf16>, vector<32x128xbf16>, vector<2x128xf32> -> vector<2x128xf32>
    %253 = arith.addf %26, %252 : vector<2x128xf32>
    %254 = arith.negf %253 : vector<2x128xf32>
    %255 = math.exp %254 : vector<2x128xf32>
    %cst_46 = arith.constant 1.000000e+00 : f32
    %256 = vector.broadcast %cst_46 : f32 to vector<2x128xf32>
    %257 = arith.addf %256, %255 : vector<2x128xf32>
    %258 = arith.divf %256, %257 : vector<2x128xf32>
    %259 = math.tanh %253 : vector<2x128xf32>
    %260 = vector.extract_strided_slice %258 {offsets = [0, 0], sizes = [2, 32], strides = [1, 1]} : vector<2x128xf32> to vector<2x32xf32>
    %261 = vector.extract_strided_slice %258 {offsets = [0, 32], sizes = [2, 32], strides = [1, 1]} : vector<2x128xf32> to vector<2x32xf32>
    %262 = vector.extract_strided_slice %259 {offsets = [0, 64], sizes = [2, 32], strides = [1, 1]} : vector<2x128xf32> to vector<2x32xf32>
    %263 = vector.extract_strided_slice %258 {offsets = [0, 96], sizes = [2, 32], strides = [1, 1]} : vector<2x128xf32> to vector<2x32xf32>
    %264 = arith.mulf %261, %226 : vector<2x32xf32>
    %265 = arith.mulf %260, %262 : vector<2x32xf32>
    %266 = arith.addf %264, %265 : vector<2x32xf32>
    %267 = math.tanh %266 : vector<2x32xf32>
    %268 = arith.mulf %263, %267 : vector<2x32xf32>
    %269 = arith.truncf %228 : vector<2x32xf32> to vector<2x32xbf16>
    %cst_47 = arith.constant dense<0.000000e+00> : vector<2x128xf32>
    %270 = tpu.matmul %269, %1, %cst_47 {dimension_numbers = #tpu.dot_dimension_numbers<[1], [0], [0], [1], [0, 0, 1, 1], [], []>} : vector<2x32xbf16>, vector<32x128xbf16>, vector<2x128xf32> -> vector<2x128xf32>
    %271 = vector.broadcast %5 : vector<1x128xf32> to vector<2x128xf32>
    %272 = arith.addf %270, %271 : vector<2x128xf32>
    %273 = arith.truncf %250 : vector<2x32xf32> to vector<2x32xbf16>
    %cst_48 = arith.constant dense<0.000000e+00> : vector<2x128xf32>
    %274 = tpu.matmul %273, %3, %cst_48 {dimension_numbers = #tpu.dot_dimension_numbers<[1], [0], [0], [1], [0, 0, 1, 1], [], []>} : vector<2x32xbf16>, vector<32x128xbf16>, vector<2x128xf32> -> vector<2x128xf32>
    %275 = arith.addf %272, %274 : vector<2x128xf32>
    %276 = arith.negf %275 : vector<2x128xf32>
    %277 = math.exp %276 : vector<2x128xf32>
    %cst_49 = arith.constant 1.000000e+00 : f32
    %278 = vector.broadcast %cst_49 : f32 to vector<2x128xf32>
    %279 = arith.addf %278, %277 : vector<2x128xf32>
    %280 = arith.divf %278, %279 : vector<2x128xf32>
    %281 = math.tanh %275 : vector<2x128xf32>
    %282 = vector.extract_strided_slice %280 {offsets = [0, 0], sizes = [2, 32], strides = [1, 1]} : vector<2x128xf32> to vector<2x32xf32>
    %283 = vector.extract_strided_slice %280 {offsets = [0, 32], sizes = [2, 32], strides = [1, 1]} : vector<2x128xf32> to vector<2x32xf32>
    %284 = vector.extract_strided_slice %281 {offsets = [0, 64], sizes = [2, 32], strides = [1, 1]} : vector<2x128xf32> to vector<2x32xf32>
    %285 = vector.extract_strided_slice %280 {offsets = [0, 96], sizes = [2, 32], strides = [1, 1]} : vector<2x128xf32> to vector<2x32xf32>
    %286 = arith.mulf %283, %248 : vector<2x32xf32>
    %287 = arith.mulf %282, %284 : vector<2x32xf32>
    %288 = arith.addf %286, %287 : vector<2x32xf32>
    %289 = math.tanh %288 : vector<2x32xf32>
    %290 = arith.mulf %285, %289 : vector<2x32xf32>
    %291 = arith.truncf %268 : vector<2x32xf32> to vector<2x32xbf16>
    %cst_50 = arith.constant dense<0.000000e+00> : vector<2x128xf32>
    %292 = tpu.matmul %291, %2, %cst_50 {dimension_numbers = #tpu.dot_dimension_numbers<[1], [0], [0], [1], [0, 0, 1, 1], [], []>} : vector<2x32xbf16>, vector<32x128xbf16>, vector<2x128xf32> -> vector<2x128xf32>
    %293 = arith.addf %28, %292 : vector<2x128xf32>
    %294 = arith.negf %293 : vector<2x128xf32>
    %295 = math.exp %294 : vector<2x128xf32>
    %cst_51 = arith.constant 1.000000e+00 : f32
    %296 = vector.broadcast %cst_51 : f32 to vector<2x128xf32>
    %297 = arith.addf %296, %295 : vector<2x128xf32>
    %298 = arith.divf %296, %297 : vector<2x128xf32>
    %299 = math.tanh %293 : vector<2x128xf32>
    %300 = vector.extract_strided_slice %298 {offsets = [0, 0], sizes = [2, 32], strides = [1, 1]} : vector<2x128xf32> to vector<2x32xf32>
    %301 = vector.extract_strided_slice %298 {offsets = [0, 32], sizes = [2, 32], strides = [1, 1]} : vector<2x128xf32> to vector<2x32xf32>
    %302 = vector.extract_strided_slice %299 {offsets = [0, 64], sizes = [2, 32], strides = [1, 1]} : vector<2x128xf32> to vector<2x32xf32>
    %303 = vector.extract_strided_slice %298 {offsets = [0, 96], sizes = [2, 32], strides = [1, 1]} : vector<2x128xf32> to vector<2x32xf32>
    %304 = arith.mulf %301, %266 : vector<2x32xf32>
    %305 = arith.mulf %300, %302 : vector<2x32xf32>
    %306 = arith.addf %304, %305 : vector<2x32xf32>
    %307 = math.tanh %306 : vector<2x32xf32>
    %308 = arith.mulf %303, %307 : vector<2x32xf32>
    %309 = arith.truncf %268 : vector<2x32xf32> to vector<2x32xbf16>
    %cst_52 = arith.constant dense<0.000000e+00> : vector<2x128xf32>
    %310 = tpu.matmul %309, %1, %cst_52 {dimension_numbers = #tpu.dot_dimension_numbers<[1], [0], [0], [1], [0, 0, 1, 1], [], []>} : vector<2x32xbf16>, vector<32x128xbf16>, vector<2x128xf32> -> vector<2x128xf32>
    %311 = vector.broadcast %5 : vector<1x128xf32> to vector<2x128xf32>
    %312 = arith.addf %310, %311 : vector<2x128xf32>
    %313 = arith.truncf %290 : vector<2x32xf32> to vector<2x32xbf16>
    %cst_53 = arith.constant dense<0.000000e+00> : vector<2x128xf32>
    %314 = tpu.matmul %313, %3, %cst_53 {dimension_numbers = #tpu.dot_dimension_numbers<[1], [0], [0], [1], [0, 0, 1, 1], [], []>} : vector<2x32xbf16>, vector<32x128xbf16>, vector<2x128xf32> -> vector<2x128xf32>
    %315 = arith.addf %312, %314 : vector<2x128xf32>
    %316 = arith.negf %315 : vector<2x128xf32>
    %317 = math.exp %316 : vector<2x128xf32>
    %cst_54 = arith.constant 1.000000e+00 : f32
    %318 = vector.broadcast %cst_54 : f32 to vector<2x128xf32>
    %319 = arith.addf %318, %317 : vector<2x128xf32>
    %320 = arith.divf %318, %319 : vector<2x128xf32>
    %321 = math.tanh %315 : vector<2x128xf32>
    %322 = vector.extract_strided_slice %320 {offsets = [0, 0], sizes = [2, 32], strides = [1, 1]} : vector<2x128xf32> to vector<2x32xf32>
    %323 = vector.extract_strided_slice %320 {offsets = [0, 32], sizes = [2, 32], strides = [1, 1]} : vector<2x128xf32> to vector<2x32xf32>
    %324 = vector.extract_strided_slice %321 {offsets = [0, 64], sizes = [2, 32], strides = [1, 1]} : vector<2x128xf32> to vector<2x32xf32>
    %325 = vector.extract_strided_slice %320 {offsets = [0, 96], sizes = [2, 32], strides = [1, 1]} : vector<2x128xf32> to vector<2x32xf32>
    %326 = arith.mulf %323, %288 : vector<2x32xf32>
    %327 = arith.mulf %322, %324 : vector<2x32xf32>
    %328 = arith.addf %326, %327 : vector<2x32xf32>
    %329 = math.tanh %328 : vector<2x32xf32>
    %330 = arith.mulf %325, %329 : vector<2x32xf32>
    %331 = arith.truncf %308 : vector<2x32xf32> to vector<2x32xbf16>
    %cst_55 = arith.constant dense<0.000000e+00> : vector<2x128xf32>
    %332 = tpu.matmul %331, %1, %cst_55 {dimension_numbers = #tpu.dot_dimension_numbers<[1], [0], [0], [1], [0, 0, 1, 1], [], []>} : vector<2x32xbf16>, vector<32x128xbf16>, vector<2x128xf32> -> vector<2x128xf32>
    %333 = vector.broadcast %5 : vector<1x128xf32> to vector<2x128xf32>
    %334 = arith.addf %332, %333 : vector<2x128xf32>
    %335 = arith.truncf %330 : vector<2x32xf32> to vector<2x32xbf16>
    %cst_56 = arith.constant dense<0.000000e+00> : vector<2x128xf32>
    %336 = tpu.matmul %335, %3, %cst_56 {dimension_numbers = #tpu.dot_dimension_numbers<[1], [0], [0], [1], [0, 0, 1, 1], [], []>} : vector<2x32xbf16>, vector<32x128xbf16>, vector<2x128xf32> -> vector<2x128xf32>
    %337 = arith.addf %334, %336 : vector<2x128xf32>
    %338 = arith.negf %337 : vector<2x128xf32>
    %339 = math.exp %338 : vector<2x128xf32>
    %cst_57 = arith.constant 1.000000e+00 : f32
    %340 = vector.broadcast %cst_57 : f32 to vector<2x128xf32>
    %341 = arith.addf %340, %339 : vector<2x128xf32>
    %342 = arith.divf %340, %341 : vector<2x128xf32>
    %343 = math.tanh %337 : vector<2x128xf32>
    %344 = vector.extract_strided_slice %342 {offsets = [0, 0], sizes = [2, 32], strides = [1, 1]} : vector<2x128xf32> to vector<2x32xf32>
    %345 = vector.extract_strided_slice %342 {offsets = [0, 32], sizes = [2, 32], strides = [1, 1]} : vector<2x128xf32> to vector<2x32xf32>
    %346 = vector.extract_strided_slice %343 {offsets = [0, 64], sizes = [2, 32], strides = [1, 1]} : vector<2x128xf32> to vector<2x32xf32>
    %347 = vector.extract_strided_slice %342 {offsets = [0, 96], sizes = [2, 32], strides = [1, 1]} : vector<2x128xf32> to vector<2x32xf32>
    %348 = arith.mulf %345, %328 : vector<2x32xf32>
    %349 = arith.mulf %344, %346 : vector<2x32xf32>
    %350 = arith.addf %348, %349 : vector<2x32xf32>
    %351 = math.tanh %350 : vector<2x32xf32>
    %352 = arith.mulf %347, %351 : vector<2x32xf32>
    %353 = arith.truncf %352 : vector<2x32xf32> to vector<2x32xbf16>
    %c0_58 = arith.constant 0 : index
    %c0_59 = arith.constant 0 : index
    %354 = vector.load %arg8[%c0_58, %c0_59] : memref<32x32xbf16, #tpu.memory_space<vmem>>, vector<32x32xbf16>
    %cst_60 = arith.constant dense<0.000000e+00> : vector<2x32xf32>
    %355 = tpu.matmul %353, %354, %cst_60 {dimension_numbers = #tpu.dot_dimension_numbers<[1], [0], [0], [1], [0, 0, 1, 1], [], []>} : vector<2x32xbf16>, vector<32x32xbf16>, vector<2x32xf32> -> vector<2x32xf32>
    %c0_61 = arith.constant 0 : index
    %c0_62 = arith.constant 0 : index
    %356 = vector.load %arg9[%c0_61, %c0_62] : memref<1x32xf32, #tpu.memory_space<vmem>>, vector<1x32xf32>
    %357 = vector.broadcast %356 : vector<1x32xf32> to vector<2x32xf32>
    %358 = arith.addf %355, %357 : vector<2x32xf32>
    %cst_63 = arith.constant 0.000000e+00 : f32
    %359 = vector.broadcast %cst_63 : f32 to vector<2x32xf32>
    %360 = arith.maximumf %358, %359 : vector<2x32xf32>
    %361 = arith.truncf %360 : vector<2x32xf32> to vector<2x32xbf16>
    %c0_64 = arith.constant 0 : index
    %c0_65 = arith.constant 0 : index
    %362 = vector.load %arg10[%c0_64, %c0_65] : memref<32x24xbf16, #tpu.memory_space<vmem>>, vector<32x24xbf16>
    %cst_66 = arith.constant dense<0.000000e+00> : vector<2x24xf32>
    %363 = tpu.matmul %361, %362, %cst_66 {dimension_numbers = #tpu.dot_dimension_numbers<[1], [0], [0], [1], [0, 0, 1, 1], [], []>} : vector<2x32xbf16>, vector<32x24xbf16>, vector<2x24xf32> -> vector<2x24xf32>
    %c0_67 = arith.constant 0 : index
    %c0_68 = arith.constant 0 : index
    %364 = vector.load %arg11[%c0_67, %c0_68] : memref<1x24xf32, #tpu.memory_space<vmem>>, vector<1x24xf32>
    %365 = vector.broadcast %364 : vector<1x24xf32> to vector<2x24xf32>
    %366 = arith.addf %363, %365 : vector<2x24xf32>
    %cst_69 = arith.constant 0.000000e+00 : f32
    %367 = vector.broadcast %cst_69 : f32 to vector<2x24xf32>
    %368 = arith.maximumf %366, %367 : vector<2x24xf32>
    %369 = arith.truncf %368 : vector<2x24xf32> to vector<2x24xbf16>
    %c0_70 = arith.constant 0 : index
    %c0_71 = arith.constant 0 : index
    %370 = vector.load %arg12[%c0_70, %c0_71] : memref<24x32xbf16, #tpu.memory_space<vmem>>, vector<24x32xbf16>
    %cst_72 = arith.constant dense<0.000000e+00> : vector<2x32xf32>
    %371 = tpu.matmul %369, %370, %cst_72 {dimension_numbers = #tpu.dot_dimension_numbers<[1], [0], [0], [1], [0, 0, 1, 1], [], []>} : vector<2x24xbf16>, vector<24x32xbf16>, vector<2x32xf32> -> vector<2x32xf32>
    %c0_73 = arith.constant 0 : index
    %c0_74 = arith.constant 0 : index
    %372 = vector.load %arg13[%c0_73, %c0_74] : memref<1x32xf32, #tpu.memory_space<vmem>>, vector<1x32xf32>
    %373 = vector.broadcast %372 : vector<1x32xf32> to vector<2x32xf32>
    %374 = arith.addf %371, %373 : vector<2x32xf32>
    %c0_75 = arith.constant 0 : index
    %c0_76 = arith.constant 0 : index
    %375 = vector.load %arg14[%c0_75, %c0_76] : memref<2x32xf32, #tpu.memory_space<vmem>>, vector<2x32xf32>
    tpu.vector_store %arg14[%c0_75, %c0_76], %374 {strides = array<i32>} : memref<2x32xf32, #tpu.memory_space<vmem>>, vector<2x32xf32>,
    return
  }
  func.func @transform_0(%arg0: i32) -> (i32, i32, i32) {
    %c0_i32 = arith.constant 0 : i32
    %c0_i32_0 = arith.constant 0 : i32
    %c0_i32_1 = arith.constant 0 : i32
    %c0_i32_2 = arith.constant 0 : i32
    return %c0_i32, %c0_i32_0, %c0_i32_1 : i32, i32, i32
  }
  func.func @transform_1(%arg0: i32) -> (i32, i32) {
    %c0_i32 = arith.constant 0 : i32
    %c0_i32_0 = arith.constant 0 : i32
    %c0_i32_1 = arith.constant 0 : i32
    return %c0_i32, %c0_i32_0 : i32, i32
  }
  func.func @transform_2(%arg0: i32) -> (i32, i32) {
    %c0_i32 = arith.constant 0 : i32
    %c0_i32_0 = arith.constant 0 : i32
    %c0_i32_1 = arith.constant 0 : i32
    return %c0_i32, %c0_i32_0 : i32, i32
  }
  func.func @transform_3(%arg0: i32) -> (i32, i32) {
    %c0_i32 = arith.constant 0 : i32
    %c0_i32_0 = arith.constant 0 : i32
    %c0_i32_1 = arith.constant 0 : i32
    return %c0_i32, %c0_i32_0 : i32, i32
  }
  func.func @transform_4(%arg0: i32) -> (i32, i32) {
    %c0_i32 = arith.constant 0 : i32
    %c0_i32_0 = arith.constant 0 : i32
    %c0_i32_1 = arith.constant 0 : i32
    return %c0_i32, %c0_i32_0 : i32, i32
  }
  func.func @transform_5(%arg0: i32) -> (i32, i32) {
    %c0_i32 = arith.constant 0 : i32
    %c0_i32_0 = arith.constant 0 : i32
    %c0_i32_1 = arith.constant 0 : i32
    return %c0_i32, %c0_i32_0 : i32, i32
  }
  func.func @transform_6(%arg0: i32) -> (i32, i32) {
    %c0_i32 = arith.constant 0 : i32
    %c0_i32_0 = arith.constant 0 : i32
    %c0_i32_1 = arith.constant 0 : i32
    return %c0_i32, %c0_i32_0 : i32, i32
  }
  func.func @transform_7(%arg0: i32) -> (i32, i32) {
    %c0_i32 = arith.constant 0 : i32
    %c0_i32_0 = arith.constant 0 : i32
    %c0_i32_1 = arith.constant 0 : i32
    return %c0_i32, %c0_i32_0 : i32, i32
  }
  func.func @transform_8(%arg0: i32) -> (i32, i32) {
    %c0_i32 = arith.constant 0 : i32
    %c0_i32_0 = arith.constant 0 : i32
    %c0_i32_1 = arith.constant 0 : i32
    return %c0_i32, %c0_i32_0 : i32, i32
  }
  func.func @transform_9(%arg0: i32) -> (i32, i32) {
    %c0_i32 = arith.constant 0 : i32
    %c0_i32_0 = arith.constant 0 : i32
    %c0_i32_1 = arith.constant 0 : i32
    return %c0_i32, %c0_i32_0 : i32, i32
  }
  func.func @transform_10(%arg0: i32) -> (i32, i32) {
    %c0_i32 = arith.constant 0 : i32
    %c0_i32_0 = arith.constant 0 : i32
    %c0_i32_1 = arith.constant 0 : i32
    return %c0_i32, %c0_i32_0 : i32, i32
  }
  func.func @transform_11(%arg0: i32) -> (i32, i32) {
    %c0_i32 = arith.constant 0 : i32
    %c0_i32_0 = arith.constant 0 : i32
    %c0_i32_1 = arith.constant 0 : i32
    return %c0_i32, %c0_i32_0 : i32, i32
  }
  func.func @transform_12(%arg0: i32) -> (i32, i32) {
    %c0_i32 = arith.constant 0 : i32
    %c0_i32_0 = arith.constant 0 : i32
    %c0_i32_1 = arith.constant 0 : i32
    return %c0_i32, %c0_i32_0 : i32, i32
  }
  func.func @transform_13(%arg0: i32) -> (i32, i32) {
    %c0_i32 = arith.constant 0 : i32
    %c0_i32_0 = arith.constant 0 : i32
    %c0_i32_1 = arith.constant 0 : i32
    return %c0_i32, %c0_i32_0 : i32, i32
  }
}

</mosaic_0001>

<bundles_post_ra>
// kernel: _lambda_.1
= control target key start
LH: loop header
LB: loop body
LE: loop exit
PB: predicated region body
PF: predicated region fallthrough
CT: control target
= control target key end

     0   :  { %18 = vsyncpa [#allocation3], 0  ;;  %s2883_s0 = inlined_call_operand.hbm [shape: f32[2,8,12], index: 0, kind: input, shape index: {}]   ;;  %s2884_s1 = inlined_call_operand.hbm [shape: bf16[12,128], index: 1, kind: input, shape index: {}]   ;;  %s2885_s2 = inlined_call_operand.hbm [shape: bf16[32,128], index: 2, kind: input, shape index: {}]   ;;  %s2886_s3 = inlined_call_operand.hbm [shape: f32[1,128], index: 3, kind: input, shape index: {}]   ;;  %s2887_s4 = inlined_call_operand.hbm [shape: bf16[32,128], index: 4, kind: input, shape index: {}]   ;;  %s2888_s5 = inlined_call_operand.hbm [shape: bf16[32,128], index: 5, kind: input, shape index: {}]   ;;  %s2889_s6 = inlined_call_operand.vmem [shape: f32[1,128], index: 6, kind: input, shape index: {}]   ;;  %s2890_s7 = inlined_call_operand.hbm [shape: bf16[32,32], index: 7, kind: input, shape index: {}]   ;;  %s2891_s8 = inlined_call_operand.vmem [shape: f32[1,32], index: 8, kind: input, shape index: {}]   ;;  %s2892_s9 = inlined_call_operand.hbm [shape: bf16[32,24], index: 9, kind: input, shape index: {}]   ;;  %s2893_s10 = inlined_call_operand.vmem [shape: f32[1,24], index: 10, kind: input, shape index: {}]   ;;  %s2894_s11 = inlined_call_operand.hbm [shape: bf16[24,32], index: 11, kind: input, shape index: {}]   ;;  %s2895_s12 = inlined_call_operand.vmem [shape: f32[1,32], index: 12, kind: input, shape index: {}]   ;;  %s2896_s13 = inlined_call_operand.vmem [shape: f32[2,32], index: 13, kind: output, shape index: {}]  }
   0x1   :  { %19 = vsyncpa [#allocation5], 0 }
   0x2   :  { %20 = vsyncpa [#allocation8], 0 }
   0x3   :  { %21 = vsyncpa [#allocation11], 0  ;;  %s40_s27 = sshll.u32 %s2884_s1, 4  ;;  %s41_s27 = int_to_ptr.hbm [resolvable:$true] %s40_s27 }
   0x4   :  { %22 = vsyncpa [#allocation14], 0  ;;  %s2436_s28 = smov [#allocation4]   ;;  %s67_s15 = sshll.u32 %s2886_s3, 4  ;;  %s68_s15 = int_to_ptr.hbm [resolvable:$true] %s67_s15 }
   0x5   :  { %s42_s29 = sshll.u32 %s2436_s28, 4  ;;  %s2437_s16 = smov 64   ;;  %s43_s29 = int_to_ptr.vmem [resolvable:$true] %s42_s29 }
   0x6   :  { %s2438_s17 = smov 4   ;;  %s2439_s18 = smov [#allocation7]  }
   0x7   :  { %48 = dma.hbm_to_vmem [thread:$0]  %s41_s27, 128, %s43_s29, [#allocation5], %s2437_s16, %s2437_s16, %s2438_s17  }
   0x8   :  { %s69_s19 = sshll.u32 %s2439_s18, 4  ;;  %s90_s21 = sshll.u32 %s2888_s5, 4  ;;  %s70_s19 = int_to_ptr.vmem [resolvable:$true] %s69_s19  ;;  %s91_s21 = int_to_ptr.hbm [resolvable:$true] %s90_s21 }
   0x9   :  { %72 = dma.hbm_to_vmem [thread:$0]  %s68_s15, 16, %s70_s19, [#allocation8]  }
   0xa   :  { %s120_s3 = sshll.u32 %s2892_s9, 4  ;;  %s2440_s24 = smov [#allocation10]   ;;  %s121_s3 = int_to_ptr.hbm [resolvable:$true] %s120_s3 }
   0xb   :  { %s92_s25 = sshll.u32 %s2440_s24, 4  ;;  %s2441_s26 = smov [#allocation13]   ;;  %s93_s25 = int_to_ptr.vmem [resolvable:$true] %s92_s25 }
   0xc   :  { %98 = dma.hbm_to_vmem [thread:$0]  %s91_s21, 256, %s93_s25, [#allocation11], %s2437_s16, %s2437_s16, %s2438_s17  }
   0xd   :  { %s122_s27 = sshll.u32 %s2441_s26, 4  ;;  %s27_s5 = sshll.u32 %s2883_s0, 4  ;;  %s123_s27 = int_to_ptr.vmem [resolvable:$true] %s122_s27  ;;  %s28_s5 = int_to_ptr.hbm [resolvable:$true] %s27_s5 }
   0xe   :  { %128 = dma.hbm_to_vmem [thread:$0]  %s121_s3, 256, %s123_s27, [#allocation14], %s2437_s16, %s2437_s16, %s2438_s17  }
   0xf   :  { %s2442_s9 = smov [#allocation2]   ;;  %s53_s18 = sshll.u32 %s2885_s2, 4  ;;  %s54_s18 = int_to_ptr.hbm [resolvable:$true] %s53_s18 }
  0x10   :  { %s29_s30 = sshll.u32 %s2442_s9, 4  ;;  %s2443_s19 = smov 128   ;;  %s30_s30 = int_to_ptr.vmem [resolvable:$true] %s29_s30 }
  0x11   :  { %s2444_s20 = smov 8   ;;  %s2445_s1 = smov [#allocation6]  }
  0x12   :  { %35 = dma.hbm_to_vmem [thread:$0]  %s28_s5, 256, %s30_s30, [#allocation3], %s2443_s19, %s2443_s19, %s2444_s20  }
  0x13   :  { %s55_s21 = sshll.u32 %s2445_s1, 4  ;;  %s77_s23 = sshll.u32 %s2887_s4, 4  ;;  %s56_s21 = int_to_ptr.vmem [resolvable:$true] %s55_s21  ;;  %s78_s23 = int_to_ptr.hbm [resolvable:$true] %s77_s23 }
  0x14   :  { %61 = dma.hbm_to_vmem [thread:$0]  %s54_s18, 256, %s56_s21, [#allocation5], %s2437_s16, %s2437_s16, %s2438_s17  }
  0x15   :  { %s105_s2 = sshll.u32 %s2890_s7, 4  ;;  %s2446_s25 = smov [#allocation9]   ;;  %s106_s2 = int_to_ptr.hbm [resolvable:$true] %s105_s2 }
  0x16   :  { %s79_s26 = sshll.u32 %s2446_s25, 4  ;;  %s2447_s27 = smov [#allocation12]   ;;  %s80_s26 = int_to_ptr.vmem [resolvable:$true] %s79_s26 }
  0x17   :  { %85 = dma.hbm_to_vmem [thread:$0]  %s78_s23, 256, %s80_s26, [#allocation8], %s2437_s16, %s2437_s16, %s2438_s17  }
  0x18   :  { %s107_s4 = sshll.u32 %s2447_s27, 4  ;;  %s135_s5 = sshll.u32 %s2894_s11, 4  ;;  %s108_s4 = int_to_ptr.vmem [resolvable:$true] %s107_s4  ;;  %s136_s5 = int_to_ptr.hbm [resolvable:$true] %s135_s5 }
  0x19   :  { %113 = dma.hbm_to_vmem [thread:$0]  %s106_s2, 256, %s108_s4, [#allocation11], %s2437_s16, %s2437_s16, %s2438_s17  }
  0x1a   :  { %s2448_s7 = smov [#allocation15]  }
  0x1b   :  { %s137_s9 = sshll.u32 %s2448_s7, 4  ;;  %s138_s9 = int_to_ptr.vmem [resolvable:$true] %s137_s9 }
  0x1c   :  { %143 = dma.hbm_to_vmem [thread:$0]  %s136_s5, 192, %s138_s9, [#allocation14], %s2437_s16, %s2437_s16, %s2438_s17  }
  0x1d   :  { %2426 = dma.done.wait [#allocation3], 256  }
  0x1e   :  { %2427 = vsyncadd [#allocation3], 4294967040 }
  0x1f   :  { %2428 = dma.done.wait [#allocation5], 384  }
  0x20   :  { %2429 = vsyncadd [#allocation5], 4294966912 }
  0x21   :  { %2430 = dma.done.wait [#allocation8], 272  }
  0x22   :  { %2431 = vsyncadd [#allocation8], 4294967024 }
  0x23   :  { %2432 = dma.done.wait [#allocation11], 512  }
  0x24   :  { %2433 = vsyncadd [#allocation11], 4294966784 }
  0x25   :  { %2434 = dma.done.wait [#allocation14], 448  }
  0x26   :  { %2435 = vsyncadd [#allocation14], 4294966848  ;;  %v2569_v0 = vld [vmem:[#allocation6 + $0x8] sm:$0xff]  ;;  %v1883_v1 = vld [vmem:[#allocation4] sm:$0xf]  ;;  %vm220_vm0 = vcmask 1045504  }
  0x27   :  { %v1979_v2 = vld [vmem:[#allocation4] sm:$0x30]  ;;  %v199_v4 = vld [vmem:[#allocation2] sm:$0xff]  ;;  %v200_v5 = vld [vmem:[#allocation2 + $0x8] sm:$0xff]  ;;  %260 = vmatpush.bf16.msra.mxu1 %v2569_v0  ;;  %368 = vmatpush.bf16.msra.mxu2 %v2569_v0  ;;  %vm216_vm1 = vcmask 97280   ;;  %v2449_v13 = vmov 0  }
  0x28   :  { %v1884_v3 = vor.u32 %v1979_v2, %v1883_v1  ;;  %v201_v6 = vpack.c.bf16 %v199_v4, %v199_v4  ;;  %v202_v7 = vpack.c.bf16 %v200_v5, %v200_v5  ;;  %v2572_v8 = vld [vmem:[#allocation6] sm:$0xff]  ;;  %v2006_v16 = vld [vmem:[#allocation7] ss:$0 sm:$0xff]  ;;  %s2450_s11 = smov 32   ;;  %v2601_v2 = vld [vmem:[#allocation9] sm:$0xff]  ;;  %vm354_vm10 = vcmask 1041409  }
  0x29   :  { %v2598_v1 = vld [vmem:[#allocation9 + $0x8] sm:$0xff]  ;;  %vm250_vm11 = vcmask 261120  }
  0x2a   :  { %v222_v9 = vsel %vm220_vm0, %v1884_v3, 0  ;;  %v208_v10 = vunpack.c.l.b16 %v201_v6  ;;  %v209_v11 = vunpack.c.l.b16 %v202_v7  ;;  %482 = vmatpush.bf16.msra.mxu3 %v2598_v1 }
  0x2b   :  { %231 = vmatpush.bf16.msra.mxu0 %v222_v9  ;;  %261 = vmatpush.bf16.msra.mxu1 %v2572_v8 }
  0x2c   :  { %v210_v12 = vpack.c.b16 %v209_v11, %v208_v10  ;;  %369 = vmatpush.bf16.msra.mxu2 %v2572_v8 }
  0x2e   :  { %1885 = vmatmul.msk.bf16.vlgmr.msra.gmra.mxu0 %vm216_vm1, %v210_v12  ;;  %262 = vmatmul.bf16.vlgmr.msra.gmra.mxu1 %v2449_v13 }
  0x2f   :  { %572 = vmatpush.bf16.msrb.mxu1 %v2569_v0  ;;  %483 = vmatpush.bf16.msra.mxu3 %v2601_v2 }
  0x30   :  { %672 = vmatpush.bf16.msrb.mxu2 %v2598_v1 }
  0x33   :  { %573 = vmatpush.bf16.msrb.mxu1 %v2572_v8 }
  0x34   :  { %673 = vmatpush.bf16.msrb.mxu2 %v2601_v2 }
  0x37   :  { %858 = vmatpush.bf16.msra.mxu1 %v2598_v1 }
  0x3b   :  { %859 = vmatpush.bf16.msra.mxu1 %v2601_v2 }
  0xab   :  { %v233_v14 = vpop.f32.mrf.mxu0  ;;  %v263_v15 = vpop.f32.mrf.mxu1 }
  0xac   :  { %v268_v17 = vrot.slane %v263_v15, 1  ;;  %v2583_v22 = vadd.f32 %v2006_v16, %v233_v14 }
  0xae   :  { %v271_v23 = vadd.f32 %v263_v15, %v2583_v22 }
  0xb0   :  { %v1894_v27 = vmul.f32 -1.442695, %v271_v23 }
  0xb3   :  { %v235_v18 = vpop.f32.mrf.mxu0  ;;  %v265_v20 = vpop.f32.mrf.mxu1 }
  0xb4   :  { %v2580_v19 = vadd.f32 %v2006_v16, %v235_v18  ;;  %v2610_v16 = vld [vmem:[#allocation10 + $0x8] sm:$0xff] }
  0xb5   :  { %507 = vmatpush.bf16.msrb.mxu0 %v2610_v16  ;;  %692 = vmatpush.bf16.msrb.mxu3 %v2610_v16 }
  0xb6   :  { %v272_v21 = vadd.f32 %v268_v17, %v2580_v19  ;;  %v2613_v17 = vld [vmem:[#allocation10] sm:$0xff] }
  0xb8   :  { %2011 = vtanh.f32 %v272_v21  ;;  %v1895_v26 = vmul.f32 -1.442695, %v272_v21  ;;  %v2632_v21 = vld [vmem:[%s2889_s6] ss:$0 sm:$0xff] }
  0xb9   :  { %2013 = vtanh.f32 %v271_v23  ;;  %508 = vmatpush.bf16.msrb.mxu0 %v2613_v17  ;;  %693 = vmatpush.bf16.msrb.mxu3 %v2613_v17 }
  0xba   :  { %2015 = vpow2.f32 %v1895_v26 }
  0xbb   :  { %2017 = vpow2.f32 %v1894_v27 }
  0xbc   :  { %509 = vmatmul.bf16.vlgmr.msrb.gmra.mxu0 %v2449_v13 }
  0xbd   :  { %758 = vmatpush.bf16.msra.mxu0 %v2569_v0 }
  0xbe   :  { %v2012_v24 = vpop.eup %2011 }
  0xbf   :  { %319 = vrot.lane.b32.xlu0 %v2012_v24, %s2437_s16  ;;  %v2014_v25 = vpop.eup %2013 }
  0xc0   :  { %v2016_v28 = vpop.eup %2015 }
  0xc1   :  { %v280_v29 = vadd.f32 1.0, %v2016_v28  ;;  %v2018_v30 = vpop.eup %2017  ;;  %759 = vmatpush.bf16.msra.mxu0 %v2572_v8 }
  0xc2   :  { %v279_v31 = vadd.f32 1.0, %v2018_v30 }
  0xc3   :  { %2019 = vrcp.f32 %v280_v29  ;;  %v307_v40 = vand.u32 2147483648, %v280_v29  ;;  %vm301_vm3 = vweird.f32 %v280_v29  ;;  %v305_v41 = vand.u32 2147483647, %v280_v29 }
  0xc4   :  { %2021 = vrcp.f32 %v279_v31  ;;  %v292_v49 = vand.u32 2147483648, %v279_v31  ;;  %vm286_vm7 = vweird.f32 %v279_v31  ;;  %v290_v50 = vand.u32 2147483647, %v279_v31 }
  0xc5   :  { %v308_v44 = vor.u32 1.1754944e-38, %v307_v40  ;;  %vm306_vm5 = vcmp.eq.f32.partialorder %v305_v41, 8.507059e+37  ;;  %1044 = vmatpush.bf16.msrb.mxu0 %v2598_v1 }
  0xc6   :  { %v293_v52 = vor.u32 1.1754944e-38, %v292_v49  ;;  %vm291_vm9 = vcmp.eq.f32.partialorder %v290_v50, 8.507059e+37 }
  0xc7   :  { %317 = vrot.lane.b32.xlu0 %v2014_v25, %s2437_s16 }
  0xc9   :  { %v2020_v32 = vpop.eup %2019  ;;  %1045 = vmatpush.bf16.msrb.mxu0 %v2601_v2 }
  0xca   :  { %v297_v33 = vmul.f32 %v2020_v32, %v280_v29  ;;  %v2022_v35 = vpop.eup %2021  ;;  %vm302_vm2 = vweird.f32 %v2020_v32 }
  0xcb   :  { %v282_v37 = vmul.f32 %v2022_v35, %v279_v31  ;;  %vm303_vm4 = vmor %vm301_vm3, %vm302_vm2  ;;  %vm287_vm6 = vweird.f32 %v2022_v35 }
  0xcc   :  { %v298_v34 = vsub.f32 1.0, %v297_v33  ;;  %vm288_vm8 = vmor %vm286_vm7, %vm287_vm6 }
  0xcd   :  { %v283_v39 = vsub.f32 1.0, %v282_v37 }
  0xce   :  { %v299_v36 = vmul.f32 %v2020_v32, %v298_v34 }
  0xcf   :  { %v284_v43 = vmul.f32 %v2022_v35, %v283_v39 }
  0xd0   :  { %v300_v38 = vadd.f32 %v2020_v32, %v299_v36 }
  0xd1   :  { %v285_v48 = vadd.f32 %v2022_v35, %v284_v43 }
  0xd2   :  { %v304_v42 = vsel %vm303_vm4, %v2020_v32, %v300_v38 }
  0xd3   :  { %v309_v46 = vsel %vm306_vm5, %v308_v44, %v304_v42  ;;  %v289_v51 = vsel %vm288_vm8, %v2022_v35, %v285_v48 }
  0xd4   :  { %v294_v54 = vsel %vm291_vm9, %v293_v52, %v289_v51  ;;  %v314_v56 = vmul.f32 0.0, %v309_v46 }
  0xd5   :  { %v313_v59 = vmul.f32 0.0, %v294_v54 }
 0x131   :  { %v320_v45 = vpop.permute.xlu0 %319 }
 0x132   :  { %v324_v47 = vmul.f32 %v320_v45, %v309_v46 }
 0x134   :  { %329 = vrot.lane.b32.xlu1 %v324_v47, %s2450_s11 }
 0x139   :  { %v318_v53 = vpop.permute.xlu0 %317  ;;  %v510_v13 = vpop.f32.mrf.mxu0 }
 0x13a   :  { %v323_v55 = vmul.f32 %v318_v53, %v294_v54 }
 0x13c   :  { %327 = vrot.lane.b32.xlu1 %v323_v55, %s2450_s11 }
 0x141   :  { %v512_v20 = vpop.f32.mrf.mxu0 }
 0x1a6   :  { %v330_v57 = vpop.permute.xlu1 %329 }
 0x1a7   :  { %v2590_v58 = vadd.f32 %v330_v57, %v314_v56 }
 0x1a9   :  { %2023 = vtanh.f32 %v2590_v58 }
 0x1ae   :  { %v328_v60 = vpop.permute.xlu1 %327 }
 0x1af   :  { %v2024_v61 = vpop.eup %2023  ;;  %v2593_v62 = vadd.f32 %v328_v60, %v313_v59 }
 0x1b0   :  { %341 = vrot.lane.b32.xlu2 %v2024_v61, %s2437_s16 }
 0x1b1   :  { %2025 = vtanh.f32 %v2593_v62 }
 0x1b7   :  { %v2026_v63 = vpop.eup %2025 }
 0x1b8   :  { %339 = vrot.lane.b32.xlu2 %v2026_v63, %s2437_s16 }
 0x20a   :  { %v342_v3 = vpop.permute.xlu2 %341 }
 0x20b   :  { %v346_v4 = vmul.f32 %v342_v3, %v309_v46 }
 0x20d   :  { %v348_v5 = vpack.c.bf16 %v346_v4, %v346_v4 }
 0x20f   :  { %v352_v7 = vunpack.c.l.b16 %v348_v5 }
 0x211   :  { %v353_v11 = vrot.slane %v352_v7, 7 }
 0x212   :  { %v340_v6 = vpop.permute.xlu2 %339 }
 0x213   :  { %v345_v9 = vmul.f32 %v340_v6, %v294_v54 }
 0x215   :  { %v347_v10 = vpack.c.bf16 %v345_v9, %v345_v9 }
 0x217   :  { %v351_v12 = vunpack.c.l.b16 %v347_v10 }
 0x219   :  { %v355_v14 = vsel %vm354_vm10, %v353_v11, %v351_v12 }
 0x21a   :  { %v356_v15 = vpack.c.b16 %v355_v14, %v355_v14 }
 0x21c   :  { %357 = vrot.lane.b32.xlu0 %v356_v15, %s2450_s11 }
 0x28e   :  { %v358_v18 = vpop.permute.xlu0 %357 }
 0x28f   :  { %1896 = vmatmul.msk.bf16.vlgmr.msra.gmra.mxu2 %vm250_vm11, %v358_v18  ;;  %1907 = vmatmul.msk.bf16.vlgmr.msra.gmra.mxu3 %vm250_vm11, %v358_v18 }
 0x290   :  { %878 = vmatpush.bf16.msra.mxu2 %v2610_v16  ;;  %944 = vmatpush.bf16.msra.mxu3 %v2569_v0 }
 0x294   :  { %879 = vmatpush.bf16.msra.mxu2 %v2613_v17  ;;  %945 = vmatpush.bf16.msra.mxu3 %v2572_v8 }
 0x312   :  { %v371_v23 = vpop.f32.mrf.mxu2  ;;  %v485_v24 = vpop.f32.mrf.mxu3 }
 0x313   :  { %v376_v25 = vrot.slane %v371_v23, 7  ;;  %v380_v26 = vadd.f32 %v371_v23, %v2580_v19  ;;  %v486_v28 = vadd.f32 %v2632_v21, %v485_v24 }
 0x315   :  { %v379_v27 = vadd.f32 %v376_v25, %v2583_v22  ;;  %2027 = vtanh.f32 %v380_v26  ;;  %v514_v29 = vadd.f32 %v510_v13, %v486_v28  ;;  %v1898_v35 = vmul.f32 -1.442695, %v380_v26 }
 0x317   :  { %2029 = vtanh.f32 %v379_v27  ;;  %v1916_v36 = vmul.f32 -1.442695, %v514_v29  ;;  %v1897_v43 = vmul.f32 -1.442695, %v379_v27  ;;  %v424_v27 = vrot.slane %v2590_v58, 7 }
 0x318   :  { %2031 = vtanh.f32 %v514_v29  ;;  %v423_v58 = vrot.slane %v2593_v62, 7 }
 0x319   :  { %2033 = vpow2.f32 %v1898_v35 }
 0x31a   :  { %v373_v30 = vpop.f32.mrf.mxu2  ;;  %v487_v31 = vpop.f32.mrf.mxu3  ;;  %2035 = vpow2.f32 %v1916_v36 }
 0x31b   :  { %v2028_v32 = vpop.eup %2027 }
 0x31c   :  { %433 = vrot.lane.b32.xlu2 %v2028_v32, %s2437_s16 }
 0x31d   :  { %v2030_v33 = vpop.eup %2029 }
 0x31e   :  { %431 = vrot.lane.b32.xlu1 %v2030_v33, %s2437_s16  ;;  %v2032_v34 = vpop.eup %2031 }
 0x31f   :  { %v2034_v37 = vpop.eup %2033 }
 0x320   :  { %v388_v38 = vadd.f32 1.0, %v2034_v37  ;;  %v2036_v39 = vpop.eup %2035 }
 0x321   :  { %v518_v40 = vadd.f32 1.0, %v2036_v39 }
 0x322   :  { %2037 = vrcp.f32 %v388_v38  ;;  %v415_v51 = vand.u32 2147483648, %v388_v38  ;;  %vm409_vm13 = vweird.f32 %v388_v38  ;;  %v413_v53 = vand.u32 2147483647, %v388_v38 }
 0x323   :  { %2039 = vrcp.f32 %v518_v40  ;;  %v530_v63 = vand.u32 2147483648, %v518_v40  ;;  %vm524_vm1 = vweird.f32 %v518_v40  ;;  %v528_v3 = vand.u32 2147483647, %v518_v40 }
 0x324   :  { %537 = vrot.lane.b32.xlu2 %v2032_v34, %s2437_s16  ;;  %2041 = vpow2.f32 %v1897_v43  ;;  %v416_v56 = vor.u32 1.1754944e-38, %v415_v51  ;;  %vm414_vm15 = vcmp.eq.f32.partialorder %v413_v53, 8.507059e+37 }
 0x325   :  { %v531_v6 = vor.u32 1.1754944e-38, %v530_v63  ;;  %vm529_vm3 = vcmp.eq.f32.partialorder %v528_v3, 8.507059e+37 }
 0x328   :  { %v2038_v41 = vpop.eup %2037 }
 0x329   :  { %v405_v42 = vmul.f32 %v2038_v41, %v388_v38  ;;  %v2040_v45 = vpop.eup %2039  ;;  %vm410_vm12 = vweird.f32 %v2038_v41 }
 0x32a   :  { %v520_v47 = vmul.f32 %v2040_v45, %v518_v40  ;;  %v2042_v48 = vpop.eup %2041  ;;  %vm411_vm14 = vmor %vm409_vm13, %vm410_vm12  ;;  %vm525_vm0 = vweird.f32 %v2040_v45 }
 0x32b   :  { %v406_v44 = vsub.f32 1.0, %v405_v42  ;;  %v387_v52 = vadd.f32 1.0, %v2042_v48  ;;  %vm526_vm2 = vmor %vm524_vm1, %vm525_vm0 }
 0x32c   :  { %v521_v50 = vsub.f32 1.0, %v520_v47 }
 0x32d   :  { %v407_v46 = vmul.f32 %v2038_v41, %v406_v44  ;;  %2043 = vrcp.f32 %v387_v52  ;;  %v400_v18 = vand.u32 2147483648, %v387_v52  ;;  %vm394_vm5 = vweird.f32 %v387_v52 }
 0x32e   :  { %v522_v55 = vmul.f32 %v2040_v45, %v521_v50  ;;  %v398_v13 = vand.u32 2147483647, %v387_v52 }
 0x32f   :  { %v408_v49 = vadd.f32 %v2038_v41, %v407_v46  ;;  %v401_v23 = vor.u32 1.1754944e-38, %v400_v18 }
 0x330   :  { %v523_v61 = vadd.f32 %v2040_v45, %v522_v55  ;;  %vm399_vm7 = vcmp.eq.f32.partialorder %v398_v13, 8.507059e+37 }
 0x331   :  { %v412_v54 = vsel %vm411_vm14, %v2038_v41, %v408_v49 }
 0x332   :  { %v417_v59 = vsel %vm414_vm15, %v416_v56, %v412_v54  ;;  %v527_v5 = vsel %vm526_vm2, %v2040_v45, %v523_v61 }
 0x333   :  { %v2044_v4 = vpop.eup %2043  ;;  %v532_v7 = vsel %vm529_vm3, %v531_v6, %v527_v5  ;;  %v428_v28 = vmul.f32 %v424_v27, %v417_v59 }
 0x334   :  { %v390_v10 = vmul.f32 %v2044_v4, %v387_v52  ;;  %vm395_vm4 = vweird.f32 %v2044_v4  ;;  %v535_v32 = vmul.f32 0.0, %v532_v7 }
 0x335   :  { %vm396_vm6 = vmor %vm394_vm5, %vm395_vm4 }
 0x336   :  { %v391_v12 = vsub.f32 1.0, %v390_v10 }
 0x338   :  { %v392_v14 = vmul.f32 %v2044_v4, %v391_v12 }
 0x33a   :  { %v393_v15 = vadd.f32 %v2044_v4, %v392_v14 }
 0x33c   :  { %v397_v20 = vsel %vm396_vm6, %v2044_v4, %v393_v15 }
 0x33d   :  { %v402_v25 = vsel %vm399_vm7, %v401_v23, %v397_v20 }
 0x33e   :  { %v427_v36 = vmul.f32 %v423_v58, %v402_v25 }
 0x376   :  { %v434_v57 = vpop.permute.xlu2 %433 }
 0x377   :  { %v438_v60 = vmul.f32 %v434_v57, %v417_v59 }
 0x379   :  { %443 = vrot.lane.b32.xlu1 %v438_v60, %s2450_s11 }
 0x37e   :  { %v538_v9 = vpop.permute.xlu2 %537 }
 0x37f   :  { %v540_v11 = vmul.f32 %v538_v9, %v532_v7 }
 0x381   :  { %542 = vrot.lane.b32.xlu2 %v540_v11, %s2450_s11 }
 0x390   :  { %v432_v24 = vpop.permute.xlu1 %431 }
 0x391   :  { %v437_v26 = vmul.f32 %v432_v24, %v402_v25 }
 0x393   :  { %441 = vrot.lane.b32.xlu0 %v437_v26, %s2450_s11 }
 0x3db   :  { %v543_v31 = vpop.permute.xlu2 %542 }
 0x3dc   :  { %v2647_v33 = vadd.f32 %v543_v31, %v535_v32 }
 0x3eb   :  { %v444_v29 = vpop.permute.xlu1 %443 }
 0x3ec   :  { %v2644_v30 = vadd.f32 %v444_v29, %v428_v28 }
 0x3ee   :  { %2045 = vtanh.f32 %v2644_v30 }
 0x3ef   :  { %2047 = vtanh.f32 %v2647_v33 }
 0x3f4   :  { %v2046_v34 = vpop.eup %2045 }
 0x3f5   :  { %455 = vrot.lane.b32.xlu1 %v2046_v34, %s2437_s16  ;;  %v2048_v35 = vpop.eup %2047 }
 0x3fd   :  { %548 = vrot.lane.b32.xlu1 %v2048_v35, %s2437_s16 }
 0x405   :  { %v442_v37 = vpop.permute.xlu0 %441 }
 0x406   :  { %v2653_v38 = vadd.f32 %v442_v37, %v427_v36 }
 0x408   :  { %2049 = vtanh.f32 %v2653_v38 }
 0x40e   :  { %v2050_v39 = vpop.eup %2049 }
 0x40f   :  { %453 = vrot.lane.b32.xlu0 %v2050_v39, %s2437_s16 }
 0x467   :  { %v456_v40 = vpop.permute.xlu1 %455 }
 0x468   :  { %v460_v44 = vmul.f32 %v456_v40, %v417_v59 }
 0x46a   :  { %v553_v47 = vpack.c.bf16 %v460_v44, %v460_v44 }
 0x46c   :  { %v557_v49 = vunpack.c.l.b16 %v553_v47 }
 0x46f   :  { %v549_v41 = vpop.permute.xlu1 %548 }
 0x470   :  { %v551_v42 = vmul.f32 %v549_v41, %v532_v7 }
 0x472   :  { %v679_v43 = vpack.c.bf16 %v551_v42, %v551_v42 }
 0x474   :  { %681 = vrot.lane.b32.xlu2 %v679_v43, %s2450_s11 }
 0x481   :  { %v454_v45 = vpop.permute.xlu0 %453 }
 0x482   :  { %v459_v46 = vmul.f32 %v454_v45, %v402_v25 }
 0x484   :  { %v552_v62 = vpack.c.bf16 %v459_v46, %v459_v46 }
 0x486   :  { %v556_v48 = vunpack.c.l.b16 %v552_v62 }
 0x488   :  { %v558_v50 = vrot.slane %v556_v48, 1 }
 0x48a   :  { %v559_v51 = vsel %vm354_vm10, %v557_v49, %v558_v50 }
 0x48b   :  { %v560_v52 = vpack.c.b16 %v559_v51, %v559_v51 }
 0x48d   :  { %561 = vrot.lane.b32.xlu0 %v560_v52, %s2450_s11 }
 0x4ce   :  { %v682_v53 = vpop.permute.xlu2 %681 }
 0x4cf   :  { %1921 = vmatmul.msk.bf16.vlgmr.msrb.gmra.mxu3 %vm250_vm11, %v682_v53 }
 0x4d0   :  { %1230 = vmatpush.bf16.msrb.mxu3 %v2598_v1 }
 0x4d4   :  { %1231 = vmatpush.bf16.msrb.mxu3 %v2601_v2 }
 0x4ff   :  { %v562_v54 = vpop.permute.xlu0 %561 }
 0x500   :  { %1917 = vmatmul.msk.bf16.vlgmr.msrb.gmra.mxu1 %vm250_vm11, %v562_v54  ;;  %1920 = vmatmul.msk.bf16.vlgmr.msrb.gmra.mxu2 %vm250_vm11, %v562_v54 }
 0x501   :  { %1064 = vmatpush.bf16.msrb.mxu1 %v2610_v16  ;;  %1130 = vmatpush.bf16.msrb.mxu2 %v2569_v0 }
 0x505   :  { %1065 = vmatpush.bf16.msrb.mxu1 %v2613_v17  ;;  %1131 = vmatpush.bf16.msrb.mxu2 %v2572_v8 }
 0x552   :  { %v695_v55 = vpop.f32.mrf.mxu3 }
 0x55a   :  { %v697_v56 = vpop.f32.mrf.mxu3 }
 0x57d   :  { %v575_v57 = vpop.f32.mrf.mxu1 }
 0x57e   :  { %v580_v59 = vrot.slane %v575_v57, 6  ;;  %v581_v60 = vrot.slane %v575_v57, 7 }
 0x580   :  { %v584_v61 = vadd.f32 %v580_v59, %v2583_v22  ;;  %v585_v63 = vadd.f32 %v581_v60, %v2580_v19 }
 0x582   :  { %2051 = vtanh.f32 %v584_v61  ;;  %v1918_v12 = vmul.f32 -1.442695, %v584_v61  ;;  %v1919_v14 = vmul.f32 -1.442695, %v585_v63 }
 0x583   :  { %2053 = vtanh.f32 %v585_v63  ;;  %v675_v3 = vpop.f32.mrf.mxu2 }
 0x584   :  { %v676_v4 = vadd.f32 %v2632_v21, %v675_v3 }
 0x585   :  { %v577_v5 = vpop.f32.mrf.mxu1 }
 0x586   :  { %v699_v6 = vadd.f32 %v695_v55, %v676_v4  ;;  %v628_v4 = vrot.slane %v2653_v38, 7 }
 0x588   :  { %v2052_v7 = vpop.eup %2051  ;;  %2055 = vtanh.f32 %v699_v6  ;;  %v1922_v15 = vmul.f32 -1.442695, %v699_v6 }
 0x589   :  { %v2054_v9 = vpop.eup %2053  ;;  %636 = vrot.lane.b32.xlu0 %v2052_v7, %s2437_s16  ;;  %2057 = vpow2.f32 %v1918_v12 }
 0x58a   :  { %638 = vrot.lane.b32.xlu1 %v2054_v9, %s2437_s16  ;;  %2059 = vpow2.f32 %v1919_v14 }
 0x58b   :  { %v677_v10 = vpop.f32.mrf.mxu2  ;;  %2061 = vpow2.f32 %v1922_v15 }
 0x58c   :  { %v629_v10 = vrot.slane %v2644_v30, 7 }
 0x58e   :  { %v2056_v11 = vpop.eup %2055 }
 0x58f   :  { %v2058_v18 = vpop.eup %2057 }
 0x590   :  { %v2060_v13 = vpop.eup %2059  ;;  %v592_v20 = vadd.f32 1.0, %v2058_v18 }
 0x591   :  { %v593_v23 = vadd.f32 1.0, %v2060_v13  ;;  %v2062_v24 = vpop.eup %2061 }
 0x592   :  { %722 = vrot.lane.b32.xlu1 %v2056_v11, %s2437_s16  ;;  %2063 = vrcp.f32 %v592_v20  ;;  %v703_v25 = vadd.f32 1.0, %v2062_v24  ;;  %v605_v40 = vand.u32 2147483648, %v592_v20  ;;  %vm599_vm12 = vweird.f32 %v592_v20 }
 0x593   :  { %2065 = vrcp.f32 %v593_v23  ;;  %v620_v42 = vand.u32 2147483648, %v593_v23  ;;  %v603_v43 = vand.u32 2147483647, %v592_v20  ;;  %vm614_vm13 = vweird.f32 %v593_v23 }
 0x594   :  { %2067 = vrcp.f32 %v703_v25  ;;  %v618_v44 = vand.u32 2147483647, %v593_v23  ;;  %v606_v47 = vor.u32 1.1754944e-38, %v605_v40  ;;  %v715_v56 = vand.u32 2147483648, %v703_v25 }
 0x595   :  { %v621_v48 = vor.u32 1.1754944e-38, %v620_v42  ;;  %vm604_vm0 = vcmp.eq.f32.partialorder %v603_v43, 8.507059e+37  ;;  %vm709_vm3 = vweird.f32 %v703_v25  ;;  %v713_v57 = vand.u32 2147483647, %v703_v25 }
 0x596   :  { %vm619_vm1 = vcmp.eq.f32.partialorder %v618_v44, 8.507059e+37  ;;  %v716_v60 = vor.u32 1.1754944e-38, %v715_v56 }
 0x597   :  { %vm714_vm5 = vcmp.eq.f32.partialorder %v713_v57, 8.507059e+37 }
 0x598   :  { %v2064_v26 = vpop.eup %2063 }
 0x599   :  { %v2066_v27 = vpop.eup %2065  ;;  %v595_v28 = vmul.f32 %v2064_v26, %v592_v20  ;;  %vm600_vm8 = vweird.f32 %v2064_v26 }
 0x59a   :  { %v610_v29 = vmul.f32 %v2066_v27, %v593_v23  ;;  %v2068_v34 = vpop.eup %2067  ;;  %vm615_vm9 = vweird.f32 %v2066_v27  ;;  %vm601_vm14 = vmor %vm599_vm12, %vm600_vm8 }
 0x59b   :  { %v596_v31 = vsub.f32 1.0, %v595_v28  ;;  %v705_v36 = vmul.f32 %v2068_v34, %v703_v25  ;;  %vm616_vm15 = vmor %vm614_vm13, %vm615_vm9  ;;  %vm710_vm2 = vweird.f32 %v2068_v34 }
 0x59c   :  { %v611_v32 = vsub.f32 1.0, %v610_v29  ;;  %vm711_vm4 = vmor %vm709_vm3, %vm710_vm2 }
 0x59d   :  { %v597_v35 = vmul.f32 %v2064_v26, %v596_v31  ;;  %v706_v41 = vsub.f32 1.0, %v705_v36 }
 0x59e   :  { %v612_v58 = vmul.f32 %v2066_v27, %v611_v32 }
 0x59f   :  { %v598_v37 = vadd.f32 %v2064_v26, %v597_v35  ;;  %v707_v62 = vmul.f32 %v2068_v34, %v706_v41 }
 0x5a0   :  { %v613_v39 = vadd.f32 %v2066_v27, %v612_v58 }
 0x5a1   :  { %v602_v45 = vsel %vm601_vm14, %v2064_v26, %v598_v37  ;;  %v708_v55 = vadd.f32 %v2068_v34, %v707_v62 }
 0x5a2   :  { %v617_v46 = vsel %vm616_vm15, %v2066_v27, %v613_v39  ;;  %v607_v50 = vsel %vm604_vm0, %v606_v47, %v602_v45 }
 0x5a3   :  { %v622_v52 = vsel %vm619_vm1, %v621_v48, %v617_v46  ;;  %v712_v59 = vsel %vm711_vm4, %v2068_v34, %v708_v55  ;;  %v632_v5 = vmul.f32 %v628_v4, %v607_v50 }
 0x5a4   :  { %v717_v63 = vsel %vm714_vm5, %v716_v60, %v712_v59  ;;  %v633_v11 = vmul.f32 %v629_v10, %v622_v52 }
 0x5a5   :  { %v720_v15 = vmul.f32 %v717_v63, %v2647_v33 }
 0x5fb   :  { %v637_v49 = vpop.permute.xlu0 %636 }
 0x5fc   :  { %v639_v51 = vpop.permute.xlu1 %638  ;;  %v642_v53 = vmul.f32 %v637_v49, %v607_v50 }
 0x5fd   :  { %v643_v54 = vmul.f32 %v639_v51, %v622_v52 }
 0x5fe   :  { %646 = vrot.lane.b32.xlu2 %v642_v53, %s2450_s11 }
 0x5ff   :  { %648 = vrot.lane.b32.xlu0 %v643_v54, %s2450_s11 }
 0x604   :  { %v723_v61 = vpop.permute.xlu1 %722 }
 0x605   :  { %v725_v3 = vmul.f32 %v723_v61, %v717_v63 }
 0x607   :  { %727 = vrot.lane.b32.xlu1 %v725_v3, %s2450_s11 }
 0x658   :  { %v647_v6 = vpop.permute.xlu2 %646 }
 0x659   :  { %v2679_v7 = vadd.f32 %v647_v6, %v632_v5 }
 0x65b   :  { %2069 = vtanh.f32 %v2679_v7 }
 0x661   :  { %v2070_v9 = vpop.eup %2069 }
 0x662   :  { %658 = vrot.lane.b32.xlu2 %v2070_v9, %s2437_s16 }
 0x671   :  { %v649_v12 = vpop.permute.xlu0 %648 }
 0x672   :  { %v2684_v14 = vadd.f32 %v649_v12, %v633_v11 }
 0x674   :  { %2071 = vtanh.f32 %v2684_v14 }
 0x679   :  { %v728_v38 = vpop.permute.xlu1 %727 }
 0x67a   :  { %v2072_v18 = vpop.eup %2071  ;;  %v2688_v13 = vadd.f32 %v728_v38, %v720_v15 }
 0x67b   :  { %660 = vrot.lane.b32.xlu0 %v2072_v18, %s2437_s16 }
 0x67c   :  { %2073 = vtanh.f32 %v2688_v13 }
 0x682   :  { %v2074_v20 = vpop.eup %2073 }
 0x683   :  { %733 = vrot.lane.b32.xlu0 %v2074_v20, %s2437_s16 }
 0x6bc   :  { %v659_v30 = vpop.permute.xlu2 %658 }
 0x6bd   :  { %v664_v23 = vmul.f32 %v659_v30, %v607_v50 }
 0x6bf   :  { %v737_v24 = vpack.c.bf16 %v664_v23, %v664_v23 }
 0x6c1   :  { %v741_v27 = vunpack.c.l.b16 %v737_v24 }
 0x6c3   :  { %v743_v33 = vrot.slane %v741_v27, 2 }
 0x6ed   :  { %v661_v25 = vpop.permute.xlu0 %660 }
 0x6ee   :  { %v665_v26 = vmul.f32 %v661_v25, %v622_v52 }
 0x6f0   :  { %v738_v28 = vpack.c.bf16 %v665_v26, %v665_v26 }
 0x6f2   :  { %v742_v29 = vunpack.c.l.b16 %v738_v28 }
 0x6f4   :  { %v744_v31 = vrot.slane %v742_v29, 1 }
 0x6f5   :  { %v734_v32 = vpop.permute.xlu0 %733 }
 0x6f6   :  { %v736_v34 = vmul.f32 %v734_v32, %v717_v63  ;;  %v745_v35 = vsel %vm354_vm10, %v744_v31, %v743_v33 }
 0x6f7   :  { %v746_v58 = vpack.c.b16 %v745_v35, %v745_v35 }
 0x6f8   :  { %v865_v36 = vpack.c.bf16 %v736_v34, %v736_v34 }
 0x6f9   :  { %747 = vrot.lane.b32.xlu2 %v746_v58, %s2450_s11 }
 0x6fa   :  { %867 = vrot.lane.b32.xlu1 %v865_v36, %s2450_s11 }
 0x753   :  { %v748_v37 = vpop.permute.xlu2 %747 }
 0x754   :  { %1923 = vmatmul.msk.bf16.vlgmr.msra.gmra.mxu0 %vm250_vm11, %v748_v37  ;;  %1926 = vmatmul.msk.bf16.vlgmr.msra.gmra.mxu1 %vm250_vm11, %v748_v37 }
 0x755   :  { %1250 = vmatpush.bf16.msra.mxu0 %v2610_v16  ;;  %1316 = vmatpush.bf16.msra.mxu1 %v2569_v0 }
 0x759   :  { %1251 = vmatpush.bf16.msra.mxu0 %v2613_v17  ;;  %1317 = vmatpush.bf16.msra.mxu1 %v2572_v8 }
 0x76c   :  { %v868_v39 = vpop.permute.xlu1 %867 }
 0x76d   :  { %1927 = vmatmul.msk.bf16.vlgmr.msra.gmra.mxu2 %vm250_vm11, %v868_v39 }
 0x76e   :  { %1416 = vmatpush.bf16.msra.mxu2 %v2598_v1 }
 0x772   :  { %1417 = vmatpush.bf16.msra.mxu2 %v2601_v2 }
 0x7d1   :  { %v761_v40 = vpop.f32.mrf.mxu0  ;;  %v861_v41 = vpop.f32.mrf.mxu1 }
 0x7d2   :  { %v766_v42 = vrot.slane %v761_v40, 5  ;;  %v767_v43 = vrot.slane %v761_v40, 6  ;;  %v862_v62 = vadd.f32 %v2632_v21, %v861_v41 }
 0x7d4   :  { %v770_v44 = vadd.f32 %v766_v42, %v2583_v22  ;;  %v771_v45 = vadd.f32 %v767_v43, %v2580_v19 }
 0x7d6   :  { %2075 = vtanh.f32 %v770_v44  ;;  %v1924_v52 = vmul.f32 -1.442695, %v770_v44  ;;  %v1925_v56 = vmul.f32 -1.442695, %v771_v45 }
 0x7d7   :  { %2077 = vtanh.f32 %v771_v45 }
 0x7d9   :  { %v763_v0 = vpop.f32.mrf.mxu0  ;;  %v863_v46 = vpop.f32.mrf.mxu1 }
 0x7da   :  { %v814_v0 = vrot.slane %v2679_v7, 7  ;;  %v815_v46 = vrot.slane %v2684_v14, 7 }
 0x7dc   :  { %v2076_v8 = vpop.eup %2075 }
 0x7dd   :  { %v2078_v47 = vpop.eup %2077  ;;  %822 = vrot.lane.b32.xlu2 %v2076_v8, %s2437_s16 }
 0x7de   :  { %824 = vrot.lane.b32.xlu0 %v2078_v47, %s2437_s16 }
 0x7f0   :  { %v881_v48 = vpop.f32.mrf.mxu2 }
 0x7f1   :  { %v885_v49 = vadd.f32 %v881_v48, %v862_v62 }
 0x7f3   :  { %2079 = vtanh.f32 %v885_v49  ;;  %v1928_v18 = vmul.f32 -1.442695, %v885_v49 }
 0x7f4   :  { %2081 = vpow2.f32 %v1924_v52 }
 0x7f8   :  { %v883_v50 = vpop.f32.mrf.mxu2 }
 0x7f9   :  { %v2080_v51 = vpop.eup %2079 }
 0x7fa   :  { %908 = vrot.lane.b32.xlu0 %v2080_v51, %s2437_s16  ;;  %v2082_v53 = vpop.eup %2081 }
 0x7fb   :  { %v778_v54 = vadd.f32 1.0, %v2082_v53 }
 0x7fd   :  { %2083 = vrcp.f32 %v778_v54  ;;  %v791_v4 = vand.u32 2147483648, %v778_v54  ;;  %vm785_vm7 = vweird.f32 %v778_v54  ;;  %v789_v5 = vand.u32 2147483647, %v778_v54 }
 0x7fe   :  { %2085 = vpow2.f32 %v1925_v56 }
 0x7ff   :  { %v792_v9 = vor.u32 1.1754944e-38, %v791_v4  ;;  %vm790_vm9 = vcmp.eq.f32.partialorder %v789_v5, 8.507059e+37 }
 0x803   :  { %v2084_v55 = vpop.eup %2083 }
 0x804   :  { %v781_v57 = vmul.f32 %v2084_v55, %v778_v54  ;;  %v2086_v61 = vpop.eup %2085  ;;  %vm786_vm6 = vweird.f32 %v2084_v55 }
 0x805   :  { %v779_v63 = vadd.f32 1.0, %v2086_v61  ;;  %vm787_vm8 = vmor %vm785_vm7, %vm786_vm6 }
 0x806   :  { %v782_v59 = vsub.f32 1.0, %v781_v57 }
 0x807   :  { %2087 = vrcp.f32 %v779_v63  ;;  %v806_v25 = vand.u32 2147483648, %v779_v63  ;;  %vm800_vm13 = vweird.f32 %v779_v63  ;;  %v804_v26 = vand.u32 2147483647, %v779_v63 }
 0x808   :  { %v783_v60 = vmul.f32 %v2084_v55, %v782_v59  ;;  %2089 = vpow2.f32 %v1928_v18 }
 0x809   :  { %v807_v29 = vor.u32 1.1754944e-38, %v806_v25  ;;  %vm805_vm15 = vcmp.eq.f32.partialorder %v804_v26, 8.507059e+37 }
 0x80a   :  { %v784_v3 = vadd.f32 %v2084_v55, %v783_v60 }
 0x80c   :  { %v788_v6 = vsel %vm787_vm8, %v2084_v55, %v784_v3 }
 0x80d   :  { %v2711_v11 = vsel %vm790_vm9, %v792_v9, %v788_v6  ;;  %v2088_v15 = vpop.eup %2087 }
 0x80e   :  { %v796_v38 = vmul.f32 %v2088_v15, %v779_v63  ;;  %v2090_v23 = vpop.eup %2089  ;;  %vm801_vm12 = vweird.f32 %v2088_v15  ;;  %v818_v8 = vmul.f32 %v814_v0, %v2711_v11 }
 0x80f   :  { %v889_v27 = vadd.f32 1.0, %v2090_v23  ;;  %vm802_vm14 = vmor %vm800_vm13, %vm801_vm12 }
 0x810   :  { %v797_v20 = vsub.f32 1.0, %v796_v38  ;;  %v2204_v38 = vld [vmem:[#allocation6] sm:$0xff] }
 0x811   :  { %2091 = vrcp.f32 %v889_v27  ;;  %v901_v39 = vand.u32 2147483648, %v889_v27  ;;  %vm895_vm1 = vweird.f32 %v889_v27  ;;  %v899_v40 = vand.u32 2147483647, %v889_v27 }
 0x812   :  { %v798_v30 = vmul.f32 %v2088_v15, %v797_v20 }
 0x813   :  { %v902_v42 = vor.u32 1.1754944e-38, %v901_v39  ;;  %vm900_vm3 = vcmp.eq.f32.partialorder %v899_v40, 8.507059e+37 }
 0x814   :  { %v799_v24 = vadd.f32 %v2088_v15, %v798_v30 }
 0x816   :  { %v803_v28 = vsel %vm802_vm14, %v2088_v15, %v799_v24 }
 0x817   :  { %v808_v33 = vsel %vm805_vm15, %v807_v29, %v803_v28  ;;  %v2092_v34 = vpop.eup %2091 }
 0x818   :  { %v891_v35 = vmul.f32 %v2092_v34, %v889_v27  ;;  %vm896_vm0 = vweird.f32 %v2092_v34  ;;  %v819_v62 = vmul.f32 %v815_v46, %v808_v33 }
 0x819   :  { %vm897_vm2 = vmor %vm895_vm1, %vm896_vm0 }
 0x81a   :  { %v892_v58 = vsub.f32 1.0, %v891_v35 }
 0x81c   :  { %v893_v36 = vmul.f32 %v2092_v34, %v892_v58 }
 0x81e   :  { %v894_v37 = vadd.f32 %v2092_v34, %v893_v36 }
 0x820   :  { %v898_v41 = vsel %vm897_vm2, %v2092_v34, %v894_v37 }
 0x821   :  { %v903_v43 = vsel %vm900_vm3, %v902_v42, %v898_v41 }
 0x822   :  { %v906_v7 = vmul.f32 %v903_v43, %v2688_v13 }
 0x837   :  { %v823_v10 = vpop.permute.xlu2 %822 }
 0x838   :  { %v828_v12 = vmul.f32 %v823_v10, %v2711_v11 }
 0x83a   :  { %832 = vrot.lane.b32.xlu1 %v828_v12, %s2450_s11 }
 0x850   :  { %v825_v31 = vpop.permute.xlu0 %824 }
 0x851   :  { %v829_v32 = vmul.f32 %v825_v31, %v808_v33 }
 0x853   :  { %834 = vrot.lane.b32.xlu2 %v829_v32, %s2450_s11 }
 0x86c   :  { %v909_v44 = vpop.permute.xlu0 %908 }
 0x86d   :  { %v911_v45 = vmul.f32 %v909_v44, %v903_v43 }
 0x86f   :  { %913 = vrot.lane.b32.xlu0 %v911_v45, %s2450_s11 }
 0x8ac   :  { %v833_v47 = vpop.permute.xlu1 %832 }
 0x8ad   :  { %v2720_v48 = vadd.f32 %v833_v47, %v818_v8  ;;  %v835_v49 = vpop.permute.xlu2 %834 }
 0x8ae   :  { %v2722_v50 = vadd.f32 %v835_v49, %v819_v62 }
 0x8af   :  { %2093 = vtanh.f32 %v2720_v48 }
 0x8b0   :  { %2095 = vtanh.f32 %v2722_v50 }
 0x8b5   :  { %v2094_v51 = vpop.eup %2093 }
 0x8b6   :  { %v2096_v52 = vpop.eup %2095  ;;  %844 = vrot.lane.b32.xlu1 %v2094_v51, %s2437_s16 }
 0x8b7   :  { %846 = vrot.lane.b32.xlu2 %v2096_v52, %s2437_s16 }
 0x8e1   :  { %v914_v14 = vpop.permute.xlu0 %913 }
 0x8e2   :  { %v2729_v53 = vadd.f32 %v914_v14, %v906_v7 }
 0x8e4   :  { %2097 = vtanh.f32 %v2729_v53 }
 0x8ea   :  { %v2098_v54 = vpop.eup %2097 }
 0x8eb   :  { %919 = vrot.lane.b32.xlu2 %v2098_v54, %s2437_s16 }
 0x911   :  { %v847_v55 = vpop.permute.xlu2 %846 }
 0x912   :  { %v851_v56 = vmul.f32 %v847_v55, %v808_v33 }
 0x914   :  { %v924_v57 = vpack.c.bf16 %v851_v56, %v851_v56 }
 0x916   :  { %v928_v61 = vunpack.c.l.b16 %v924_v57 }
 0x918   :  { %v930_v4 = vrot.slane %v928_v61, 2 }
 0x928   :  { %v845_v59 = vpop.permute.xlu1 %844 }
 0x929   :  { %v850_v60 = vmul.f32 %v845_v59, %v2711_v11  ;;  %v2203_v11 = vld [vmem:[#allocation6 + $0x8] sm:$0xff] }
 0x92b   :  { %v923_v63 = vpack.c.bf16 %v850_v60, %v850_v60 }
 0x92d   :  { %v927_v3 = vunpack.c.l.b16 %v923_v63 }
 0x92f   :  { %v929_v5 = vrot.slane %v927_v3, 3 }
 0x931   :  { %v931_v13 = vsel %vm354_vm10, %v930_v4, %v929_v5 }
 0x932   :  { %v932_v6 = vpack.c.b16 %v931_v13, %v931_v13 }
 0x934   :  { %933 = vrot.lane.b32.xlu1 %v932_v6, %s2450_s11 }
 0x945   :  { %v920_v9 = vpop.permute.xlu2 %919 }
 0x946   :  { %v922_v10 = vmul.f32 %v920_v9, %v903_v43 }
 0x948   :  { %v1051_v12 = vpack.c.bf16 %v922_v10, %v922_v10 }
 0x94a   :  { %1053 = vrot.lane.b32.xlu0 %v1051_v12, %s2450_s11 }
 0x9a6   :  { %v934_v15 = vpop.permute.xlu1 %933 }
 0x9a7   :  { %1929 = vmatmul.msk.bf16.vlgmr.msra.gmra.mxu3 %vm250_vm11, %v934_v15  ;;  %1932 = vmatmul.msk.bf16.vlgmr.msrb.gmra.mxu0 %vm250_vm11, %v934_v15 }
 0x9a8   :  { %1436 = vmatpush.bf16.msra.mxu3 %v2610_v16  ;;  %1502 = vmatpush.bf16.msrb.mxu0 %v2203_v11 }
 0x9ac   :  { %1437 = vmatpush.bf16.msra.mxu3 %v2613_v17  ;;  %1503 = vmatpush.bf16.msrb.mxu0 %v2204_v38 }
 0x9bc   :  { %v1054_v18 = vpop.permute.xlu0 %1053 }
 0x9bd   :  { %1933 = vmatmul.msk.bf16.vlgmr.msrb.gmra.mxu1 %vm250_vm11, %v1054_v18 }
 0x9be   :  { %1602 = vmatpush.bf16.msrb.mxu1 %v2598_v1 }
 0x9c2   :  { %1603 = vmatpush.bf16.msrb.mxu1 %v2601_v2 }
 0xa24   :  { %v1047_v20 = vpop.f32.mrf.mxu0 }
 0xa25   :  { %v1048_v1 = vadd.f32 %v2632_v21, %v1047_v20 }
 0xa2a   :  { %v947_v30 = vpop.f32.mrf.mxu3 }
 0xa2b   :  { %v952_v23 = vrot.slane %v947_v30, 4  ;;  %v953_v24 = vrot.slane %v947_v30, 5  ;;  %v1001_v30 = vrot.slane %v2722_v50, 7 }
 0xa2c   :  { %v1049_v25 = vpop.f32.mrf.mxu0 }
 0xa2d   :  { %v956_v16 = vadd.f32 %v952_v23, %v2583_v22  ;;  %v957_v26 = vadd.f32 %v953_v24, %v2580_v19 }
 0xa2f   :  { %2099 = vtanh.f32 %v956_v16  ;;  %v1931_v32 = vmul.f32 -1.442695, %v957_v26  ;;  %v1930_v36 = vmul.f32 -1.442695, %v956_v16 }
 0xa30   :  { %2101 = vtanh.f32 %v957_v26  ;;  %v1000_v26 = vrot.slane %v2720_v48, 7 }
 0xa32   :  { %v949_v17 = vpop.f32.mrf.mxu3 }
 0xa35   :  { %v2100_v27 = vpop.eup %2099 }
 0xa36   :  { %v2102_v28 = vpop.eup %2101  ;;  %1008 = vrot.lane.b32.xlu1 %v2100_v27, %s2437_s16 }
 0xa37   :  { %1010 = vrot.lane.b32.xlu2 %v2102_v28, %s2437_s16 }
 0xa3a   :  { %v1067_v2 = vpop.f32.mrf.mxu1 }
 0xa3b   :  { %v1071_v29 = vadd.f32 %v1067_v2, %v1048_v1 }
 0xa3d   :  { %2103 = vtanh.f32 %v1071_v29  ;;  %v1934_v42 = vmul.f32 -1.442695, %v1071_v29 }
 0xa3e   :  { %2105 = vpow2.f32 %v1931_v32 }
 0xa42   :  { %v1069_v33 = vpop.f32.mrf.mxu1 }
 0xa43   :  { %v2104_v31 = vpop.eup %2103 }
 0xa44   :  { %1094 = vrot.lane.b32.xlu0 %v2104_v31, %s2437_s16  ;;  %v2106_v34 = vpop.eup %2105 }
 0xa45   :  { %v965_v35 = vadd.f32 1.0, %v2106_v34 }
 0xa47   :  { %2107 = vrcp.f32 %v965_v35  ;;  %v992_v44 = vand.u32 2147483648, %v965_v35  ;;  %vm986_vm5 = vweird.f32 %v965_v35  ;;  %v990_v45 = vand.u32 2147483647, %v965_v35 }
 0xa48   :  { %2109 = vpow2.f32 %v1930_v36 }
 0xa49   :  { %v993_v46 = vor.u32 1.1754944e-38, %v992_v44  ;;  %vm991_vm7 = vcmp.eq.f32.partialorder %v990_v45, 8.507059e+37  ;;  %v2205_v45 = vld [vmem:[#allocation10 + $0x8] sm:$0xff] }
 0xa4d   :  { %v2108_v58 = vpop.eup %2107 }
 0xa4e   :  { %v982_v37 = vmul.f32 %v2108_v58, %v965_v35  ;;  %v2110_v40 = vpop.eup %2109  ;;  %vm987_vm4 = vweird.f32 %v2108_v58 }
 0xa4f   :  { %v964_v21 = vadd.f32 1.0, %v2110_v40  ;;  %vm988_vm6 = vmor %vm986_vm5, %vm987_vm4 }
 0xa50   :  { %v983_v39 = vsub.f32 1.0, %v982_v37 }
 0xa51   :  { %2111 = vrcp.f32 %v964_v21  ;;  %v977_v57 = vand.u32 2147483648, %v964_v21  ;;  %vm971_vm9 = vweird.f32 %v964_v21  ;;  %v975_v59 = vand.u32 2147483647, %v964_v21 }
 0xa52   :  { %v984_v41 = vmul.f32 %v2108_v58, %v983_v39  ;;  %2113 = vpow2.f32 %v1934_v42 }
 0xa53   :  { %v978_v63 = vor.u32 1.1754944e-38, %v977_v57  ;;  %vm976_vm13 = vcmp.eq.f32.partialorder %v975_v59, 8.507059e+37 }
 0xa54   :  { %v985_v43 = vadd.f32 %v2108_v58, %v984_v41 }
 0xa56   :  { %v989_v0 = vsel %vm988_vm6, %v2108_v58, %v985_v43 }
 0xa57   :  { %v994_v8 = vsel %vm991_vm7, %v993_v46, %v989_v0  ;;  %v2112_v62 = vpop.eup %2111  ;;  %v2206_v0 = vld [vmem:[#allocation10] sm:$0xff] }
 0xa58   :  { %v2114_v51 = vpop.eup %2113  ;;  %v967_v52 = vmul.f32 %v2112_v62, %v964_v21  ;;  %vm972_vm8 = vweird.f32 %v2112_v62  ;;  %v1005_v23 = vmul.f32 %v1001_v30, %v994_v8 }
 0xa59   :  { %v1075_v7 = vadd.f32 1.0, %v2114_v51  ;;  %vm973_vm12 = vmor %vm971_vm9, %vm972_vm8 }
 0xa5a   :  { %v968_v14 = vsub.f32 1.0, %v967_v52 }
 0xa5b   :  { %2115 = vrcp.f32 %v1075_v7  ;;  %v1087_v10 = vand.u32 2147483648, %v1075_v7  ;;  %vm1081_vm15 = vweird.f32 %v1075_v7  ;;  %v1085_v12 = vand.u32 2147483647, %v1075_v7 }
 0xa5c   :  { %v969_v54 = vmul.f32 %v2112_v62, %v968_v14 }
 0xa5d   :  { %v1088_v11 = vor.u32 1.1754944e-38, %v1087_v10  ;;  %vm1086_vm1 = vcmp.eq.f32.partialorder %v1085_v12, 8.507059e+37 }
 0xa5e   :  { %v970_v56 = vadd.f32 %v2112_v62, %v969_v54  ;;  %v2777_v54 = vld [vmem:[%s2889_s6] ss:$0 sm:$0xff] }
 0xa60   :  { %v974_v61 = vsel %vm973_vm12, %v2112_v62, %v970_v56 }
 0xa61   :  { %v2116_v55 = vpop.eup %2115  ;;  %v979_v5 = vsel %vm976_vm13, %v978_v63, %v974_v61 }
 0xa62   :  { %v1077_v60 = vmul.f32 %v2116_v55, %v1075_v7  ;;  %vm1082_vm14 = vweird.f32 %v2116_v55  ;;  %v1004_v17 = vmul.f32 %v1000_v26, %v979_v5 }
 0xa63   :  { %vm1083_vm0 = vmor %vm1081_vm15, %vm1082_vm14 }
 0xa64   :  { %v1078_v3 = vsub.f32 1.0, %v1077_v60 }
 0xa66   :  { %v1079_v6 = vmul.f32 %v2116_v55, %v1078_v3 }
 0xa68   :  { %v1080_v9 = vadd.f32 %v2116_v55, %v1079_v6 }
 0xa6a   :  { %v1084_v15 = vsel %vm1083_vm0, %v2116_v55, %v1080_v9 }
 0xa6b   :  { %v1089_v18 = vsel %vm1086_vm1, %v1088_v11, %v1084_v15 }
 0xa6c   :  { %v1092_v50 = vmul.f32 %v1089_v18, %v2729_v53 }
 0xa91   :  { %v1011_v47 = vpop.permute.xlu2 %1010 }
 0xa92   :  { %v1015_v49 = vmul.f32 %v1011_v47, %v994_v8  ;;  %v2208_v47 = vld [vmem:[#allocation9] sm:$0xff] }
 0xa94   :  { %1020 = vrot.lane.b32.xlu2 %v1015_v49, %s2450_s11 }
 0xaa8   :  { %v1009_v4 = vpop.permute.xlu1 %1008 }
 0xaa9   :  { %v1014_v13 = vmul.f32 %v1009_v4, %v979_v5 }
 0xaab   :  { %1018 = vrot.lane.b32.xlu1 %v1014_v13, %s2450_s11 }
 0xab6   :  { %v1095_v38 = vpop.permute.xlu0 %1094 }
 0xab7   :  { %v1097_v20 = vmul.f32 %v1095_v38, %v1089_v18 }
 0xab9   :  { %1099 = vrot.lane.b32.xlu0 %v1097_v20, %s2450_s11 }
 0xaee   :  { %v1021_v24 = vpop.permute.xlu2 %1020 }
 0xaef   :  { %v2754_v25 = vadd.f32 %v1021_v24, %v1005_v23 }
 0xaf1   :  { %2117 = vtanh.f32 %v2754_v25 }
 0xaf7   :  { %v2118_v16 = vpop.eup %2117 }
 0xaf8   :  { %1032 = vrot.lane.b32.xlu2 %v2118_v16, %s2437_s16 }
 0xb1d   :  { %v1019_v27 = vpop.permute.xlu1 %1018 }
 0xb1e   :  { %v2759_v28 = vadd.f32 %v1019_v27, %v1004_v17 }
 0xb20   :  { %2119 = vtanh.f32 %v2759_v28 }
 0xb26   :  { %v2120_v1 = vpop.eup %2119 }
 0xb27   :  { %1030 = vrot.lane.b32.xlu1 %v2120_v1, %s2437_s16 }
 0xb2b   :  { %v1100_v2 = vpop.permute.xlu0 %1099 }
 0xb2c   :  { %v2764_v29 = vadd.f32 %v1100_v2, %v1092_v50 }
 0xb2e   :  { %2121 = vtanh.f32 %v2764_v29 }
 0xb34   :  { %v2122_v33 = vpop.eup %2121 }
 0xb35   :  { %1105 = vrot.lane.b32.xlu0 %v2122_v33, %s2437_s16 }
 0xb52   :  { %v1033_v48 = vpop.permute.xlu2 %1032 }
 0xb53   :  { %v1037_v31 = vmul.f32 %v1033_v48, %v994_v8  ;;  %v2207_v8 = vld [vmem:[#allocation9 + $0x8] sm:$0xff] }
 0xb55   :  { %v1110_v32 = vpack.c.bf16 %v1037_v31, %v1037_v31 }
 0xb57   :  { %v1114_v58 = vunpack.c.l.b16 %v1110_v32 }
 0xb59   :  { %v1116_v39 = vrot.slane %v1114_v58, 3 }
 0xb99   :  { %v1031_v34 = vpop.permute.xlu1 %1030 }
 0xb9a   :  { %v1036_v35 = vmul.f32 %v1031_v34, %v979_v5 }
 0xb9c   :  { %v1109_v36 = vpack.c.bf16 %v1036_v35, %v1036_v35 }
 0xb9e   :  { %v1113_v37 = vunpack.c.l.b16 %v1109_v36 }
 0xba0   :  { %v1115_v40 = vrot.slane %v1113_v37, 4 }
 0xba2   :  { %v1117_v53 = vsel %vm354_vm10, %v1116_v39, %v1115_v40 }
 0xba3   :  { %v1118_v41 = vpack.c.b16 %v1117_v53, %v1117_v53 }
 0xba5   :  { %1119 = vrot.lane.b32.xlu1 %v1118_v41, %s2450_s11 }
 0xba7   :  { %v1106_v21 = vpop.permute.xlu0 %1105 }
 0xba8   :  { %v1108_v42 = vmul.f32 %v1106_v21, %v1089_v18 }
 0xbaa   :  { %v1237_v43 = vpack.c.bf16 %v1108_v42, %v1108_v42 }
 0xbac   :  { %1239 = vrot.lane.b32.xlu2 %v1237_v43, %s2450_s11 }
 0xc06   :  { %v1240_v44 = vpop.permute.xlu2 %1239 }
 0xc07   :  { %1939 = vmatmul.msk.bf16.vlgmr.msra.gmra.mxu0 %vm250_vm11, %v1240_v44 }
 0xc08   :  { %1708 = vmatpush.bf16.msra.mxu0 %v2205_v45 }
 0xc0c   :  { %1709 = vmatpush.bf16.msra.mxu0 %v2206_v0 }
 0xc17   :  { %v1120_v46 = vpop.permute.xlu1 %1119 }
 0xc18   :  { %1935 = vmatmul.msk.bf16.vlgmr.msrb.gmra.mxu2 %vm250_vm11, %v1120_v46  ;;  %1938 = vmatmul.msk.bf16.vlgmr.msrb.gmra.mxu3 %vm250_vm11, %v1120_v46 }
 0xc19   :  { %1622 = vmatpush.bf16.msrb.mxu2 %v2205_v45  ;;  %1688 = vmatpush.bf16.msrb.mxu3 %v2207_v8 }
 0xc1d   :  { %1623 = vmatpush.bf16.msrb.mxu2 %v2206_v0  ;;  %1689 = vmatpush.bf16.msrb.mxu3 %v2208_v47 }
 0xc84   :  { %v1253_v62 = vpop.f32.mrf.mxu0 }
 0xc8c   :  { %v1255_v49 = vpop.f32.mrf.mxu0 }
 0xc9b   :  { %v1133_v51 = vpop.f32.mrf.mxu2  ;;  %v1233_v52 = vpop.f32.mrf.mxu3 }
 0xc9c   :  { %v1138_v7 = vrot.slane %v1133_v51, 3  ;;  %v1139_v14 = vrot.slane %v1133_v51, 4  ;;  %v1234_v55 = vadd.f32 %v2777_v54, %v1233_v52 }
 0xc9e   :  { %v1142_v56 = vadd.f32 %v1138_v7, %v2583_v22  ;;  %v1143_v57 = vadd.f32 %v1139_v14, %v2580_v19  ;;  %v1257_v59 = vadd.f32 %v1253_v62, %v1234_v55  ;;  %v1186_v55 = vrot.slane %v2759_v28, 7 }
 0xca0   :  { %2123 = vtanh.f32 %v1142_v56  ;;  %v1940_v5 = vmul.f32 -1.442695, %v1257_v59  ;;  %v1936_v9 = vmul.f32 -1.442695, %v1142_v56  ;;  %v1937_v10 = vmul.f32 -1.442695, %v1143_v57 }
 0xca1   :  { %2125 = vtanh.f32 %v1143_v57  ;;  %v1187_v56 = vrot.slane %v2754_v25, 7 }
 0xca2   :  { %2127 = vtanh.f32 %v1257_v59 }
 0xca3   :  { %v1135_v60 = vpop.f32.mrf.mxu2  ;;  %v1235_v61 = vpop.f32.mrf.mxu3  ;;  %2129 = vpow2.f32 %v1940_v5 }
 0xca6   :  { %v2124_v63 = vpop.eup %2123 }
 0xca7   :  { %v2126_v3 = vpop.eup %2125  ;;  %1194 = vrot.lane.b32.xlu0 %v2124_v63, %s2437_s16 }
 0xca8   :  { %1196 = vrot.lane.b32.xlu1 %v2126_v3, %s2437_s16  ;;  %v2128_v4 = vpop.eup %2127 }
 0xca9   :  { %1280 = vrot.lane.b32.xlu2 %v2128_v4, %s2437_s16  ;;  %v2130_v13 = vpop.eup %2129 }
 0xcaa   :  { %v1261_v6 = vadd.f32 1.0, %v2130_v13 }
 0xcac   :  { %2131 = vrcp.f32 %v1261_v6  ;;  %v1273_v16 = vand.u32 2147483648, %v1261_v6  ;;  %vm1267_vm3 = vweird.f32 %v1261_v6  ;;  %v1271_v26 = vand.u32 2147483647, %v1261_v6 }
 0xcad   :  { %2133 = vpow2.f32 %v1936_v9 }
 0xcae   :  { %2135 = vpow2.f32 %v1937_v10  ;;  %v1274_v50 = vor.u32 1.1754944e-38, %v1273_v16  ;;  %vm1272_vm5 = vcmp.eq.f32.partialorder %v1271_v26, 8.507059e+37 }
 0xcb2   :  { %v2132_v12 = vpop.eup %2131 }
 0xcb3   :  { %v1263_v15 = vmul.f32 %v2132_v12, %v1261_v6  ;;  %v2134_v11 = vpop.eup %2133  ;;  %vm1268_vm2 = vweird.f32 %v2132_v12 }
 0xcb4   :  { %v2136_v38 = vpop.eup %2135  ;;  %v1150_v20 = vadd.f32 1.0, %v2134_v11  ;;  %vm1269_vm4 = vmor %vm1267_vm3, %vm1268_vm2 }
 0xcb5   :  { %v1264_v18 = vsub.f32 1.0, %v1263_v15  ;;  %v1151_v30 = vadd.f32 1.0, %v2136_v38 }
 0xcb6   :  { %2137 = vrcp.f32 %v1150_v20  ;;  %v1163_v40 = vand.u32 2147483648, %v1150_v20  ;;  %vm1157_vm8 = vweird.f32 %v1150_v20  ;;  %v1161_v41 = vand.u32 2147483647, %v1150_v20 }
 0xcb7   :  { %v1265_v23 = vmul.f32 %v2132_v12, %v1264_v18  ;;  %2139 = vrcp.f32 %v1151_v30  ;;  %v1178_v53 = vand.u32 2147483648, %v1151_v30  ;;  %vm1172_vm9 = vweird.f32 %v1151_v30 }
 0xcb8   :  { %v1176_v21 = vand.u32 2147483647, %v1151_v30  ;;  %v1164_v44 = vor.u32 1.1754944e-38, %v1163_v40  ;;  %vm1162_vm14 = vcmp.eq.f32.partialorder %v1161_v41, 8.507059e+37 }
 0xcb9   :  { %v1266_v24 = vadd.f32 %v2132_v12, %v1265_v23  ;;  %v1179_v45 = vor.u32 1.1754944e-38, %v1178_v53 }
 0xcba   :  { %vm1177_vm15 = vcmp.eq.f32.partialorder %v1176_v21, 8.507059e+37 }
 0xcbb   :  { %v1270_v27 = vsel %vm1269_vm4, %v2132_v12, %v1266_v24 }
 0xcbc   :  { %v2138_v17 = vpop.eup %2137  ;;  %v1275_v33 = vsel %vm1272_vm5, %v1274_v50, %v1270_v27 }
 0xcbd   :  { %v2140_v1 = vpop.eup %2139  ;;  %v1153_v48 = vmul.f32 %v2138_v17, %v1150_v20  ;;  %vm1158_vm6 = vweird.f32 %v2138_v17  ;;  %v1278_v51 = vmul.f32 %v1275_v33, %v2764_v29 }
 0xcbe   :  { %v1168_v32 = vmul.f32 %v2140_v1, %v1151_v30  ;;  %vm1173_vm7 = vweird.f32 %v2140_v1  ;;  %vm1159_vm12 = vmor %vm1157_vm8, %vm1158_vm6 }
 0xcbf   :  { %v1154_v34 = vsub.f32 1.0, %v1153_v48  ;;  %vm1174_vm13 = vmor %vm1172_vm9, %vm1173_vm7 }
 0xcc0   :  { %v1169_v35 = vsub.f32 1.0, %v1168_v32 }
 0xcc1   :  { %v1155_v58 = vmul.f32 %v2138_v17, %v1154_v34 }
 0xcc2   :  { %v1170_v36 = vmul.f32 %v2140_v1, %v1169_v35 }
 0xcc3   :  { %v1156_v37 = vadd.f32 %v2138_v17, %v1155_v58 }
 0xcc4   :  { %v1171_v39 = vadd.f32 %v2140_v1, %v1170_v36 }
 0xcc5   :  { %v1160_v42 = vsel %vm1159_vm12, %v2138_v17, %v1156_v37 }
 0xcc6   :  { %v1175_v43 = vsel %vm1174_vm13, %v2140_v1, %v1171_v39  ;;  %v1165_v46 = vsel %vm1162_vm14, %v1164_v44, %v1160_v42 }
 0xcc7   :  { %v1180_v47 = vsel %vm1177_vm15, %v1179_v45, %v1175_v43  ;;  %v1190_v57 = vmul.f32 %v1186_v55, %v1165_v46 }
 0xcc8   :  { %v1191_v59 = vmul.f32 %v1187_v56, %v1180_v47 }
 0xd03   :  { %v1281_v2 = vpop.permute.xlu2 %1280 }
 0xd04   :  { %v1283_v31 = vmul.f32 %v1281_v2, %v1275_v33 }
 0xd06   :  { %1285 = vrot.lane.b32.xlu2 %v1283_v31, %s2450_s11 }
 0xd19   :  { %v1195_v0 = vpop.permute.xlu0 %1194 }
 0xd1a   :  { %v1197_v8 = vpop.permute.xlu1 %1196  ;;  %v1200_v62 = vmul.f32 %v1195_v0, %v1165_v46 }
 0xd1b   :  { %v1201_v49 = vmul.f32 %v1197_v8, %v1180_v47 }
 0xd1c   :  { %1204 = vrot.lane.b32.xlu0 %v1200_v62, %s2450_s11 }
 0xd1d   :  { %1206 = vrot.lane.b32.xlu1 %v1201_v49, %s2450_s11 }
 0xd60   :  { %v1286_v52 = vpop.permute.xlu2 %1285 }
 0xd61   :  { %v2789_v7 = vadd.f32 %v1286_v52, %v1278_v51 }
 0xd63   :  { %2141 = vtanh.f32 %v2789_v7 }
 0xd69   :  { %v2142_v14 = vpop.eup %2141 }
 0xd6a   :  { %1291 = vrot.lane.b32.xlu2 %v2142_v14, %s2437_s16 }
 0xd8e   :  { %v1205_v60 = vpop.permute.xlu0 %1204 }
 0xd8f   :  { %v1207_v61 = vpop.permute.xlu1 %1206  ;;  %v2795_v63 = vadd.f32 %v1205_v60, %v1190_v57 }
 0xd90   :  { %v2797_v3 = vadd.f32 %v1207_v61, %v1191_v59 }
 0xd91   :  { %2143 = vtanh.f32 %v2795_v63 }
 0xd92   :  { %2145 = vtanh.f32 %v2797_v3 }
 0xd97   :  { %v2144_v29 = vpop.eup %2143 }
 0xd98   :  { %v2146_v4 = vpop.eup %2145  ;;  %1216 = vrot.lane.b32.xlu0 %v2144_v29, %s2437_s16 }
 0xd99   :  { %1218 = vrot.lane.b32.xlu1 %v2146_v4, %s2437_s16 }
 0xdc4   :  { %v1292_v28 = vpop.permute.xlu2 %1291 }
 0xdc5   :  { %v1294_v25 = vmul.f32 %v1292_v28, %v1275_v33 }
 0xdc7   :  { %v1423_v5 = vpack.c.bf16 %v1294_v25, %v1294_v25 }
 0xdc9   :  { %1425 = vrot.lane.b32.xlu1 %v1423_v5, %s2450_s11 }
 0xe0a   :  { %v1217_v13 = vpop.permute.xlu0 %1216 }
 0xe0b   :  { %v1219_v6 = vpop.permute.xlu1 %1218  ;;  %v1222_v9 = vmul.f32 %v1217_v13, %v1165_v46 }
 0xe0c   :  { %v1223_v10 = vmul.f32 %v1219_v6, %v1180_v47 }
 0xe0d   :  { %v1295_v12 = vpack.c.bf16 %v1222_v9, %v1222_v9 }
 0xe0e   :  { %v1296_v15 = vpack.c.bf16 %v1223_v10, %v1223_v10 }
 0xe0f   :  { %v1299_v11 = vunpack.c.l.b16 %v1295_v12 }
 0xe10   :  { %v1300_v38 = vunpack.c.l.b16 %v1296_v15 }
 0xe11   :  { %v1301_v18 = vrot.slane %v1299_v11, 5 }
 0xe12   :  { %v1302_v20 = vrot.slane %v1300_v38, 4 }
 0xe14   :  { %v1303_v30 = vsel %vm354_vm10, %v1302_v20, %v1301_v18 }
 0xe15   :  { %v1304_v23 = vpack.c.b16 %v1303_v30, %v1303_v30 }
 0xe17   :  { %1305 = vrot.lane.b32.xlu0 %v1304_v23, %s2450_s11 }
 0xe3b   :  { %v1426_v24 = vpop.permute.xlu1 %1425 }
 0xe3c   :  { %1945 = vmatmul.msk.bf16.vlgmr.msra.gmra.mxu3 %vm250_vm11, %v1426_v24 }
 0xe89   :  { %v1306_v16 = vpop.permute.xlu0 %1305 }
 0xe8a   :  { %1941 = vmatmul.msk.bf16.vlgmr.msra.gmra.mxu1 %vm250_vm11, %v1306_v16  ;;  %1944 = vmatmul.msk.bf16.vlgmr.msra.gmra.mxu2 %vm250_vm11, %v1306_v16 }
 0xebf   :  { %v1439_v26 = vpop.f32.mrf.mxu3 }
 0xec7   :  { %v1441_v17 = vpop.f32.mrf.mxu3 }
 0xf07   :  { %v1319_v27 = vpop.f32.mrf.mxu1 }
 0xf08   :  { %v1324_v1 = vrot.slane %v1319_v27, 2  ;;  %v1325_v50 = vrot.slane %v1319_v27, 3  ;;  %v1372_v27 = vrot.slane %v2795_v63, 7 }
 0xf0a   :  { %v1328_v2 = vadd.f32 %v1324_v1, %v2583_v22  ;;  %v1329_v33 = vadd.f32 %v1325_v50, %v2580_v19 }
 0xf0c   :  { %2147 = vtanh.f32 %v1328_v2  ;;  %v1942_v39 = vmul.f32 -1.442695, %v1328_v2  ;;  %v1943_v21 = vmul.f32 -1.442695, %v1329_v33 }
 0xf0d   :  { %2149 = vtanh.f32 %v1329_v33  ;;  %v1419_v48 = vpop.f32.mrf.mxu2 }
 0xf0e   :  { %v1420_v31 = vadd.f32 %v2777_v54, %v1419_v48  ;;  %v1373_v48 = vrot.slane %v2797_v3, 7 }
 0xf0f   :  { %v1321_v32 = vpop.f32.mrf.mxu1 }
 0xf10   :  { %v1443_v34 = vadd.f32 %v1439_v26, %v1420_v31 }
 0xf12   :  { %v2148_v35 = vpop.eup %2147  ;;  %2151 = vtanh.f32 %v1443_v34  ;;  %v1946_v43 = vmul.f32 -1.442695, %v1443_v34 }
 0xf13   :  { %v2150_v58 = vpop.eup %2149  ;;  %1380 = vrot.lane.b32.xlu2 %v2148_v35, %s2437_s16  ;;  %2153 = vpow2.f32 %v1942_v39 }
 0xf14   :  { %1382 = vrot.lane.b32.xlu0 %v2150_v58, %s2437_s16 }
 0xf15   :  { %v1421_v36 = vpop.f32.mrf.mxu2 }
 0xf18   :  { %v2152_v37 = vpop.eup %2151 }
 0xf19   :  { %1466 = vrot.lane.b32.xlu1 %v2152_v37, %s2437_s16  ;;  %v2154_v40 = vpop.eup %2153 }
 0xf1a   :  { %v1336_v53 = vadd.f32 1.0, %v2154_v40 }
 0xf1c   :  { %2155 = vrcp.f32 %v1336_v53  ;;  %v1349_v47 = vand.u32 2147483648, %v1336_v53  ;;  %vm1343_vm1 = vweird.f32 %v1336_v53  ;;  %v1347_v49 = vand.u32 2147483647, %v1336_v53 }
 0xf1d   :  { %2157 = vpow2.f32 %v1943_v21 }
 0xf1e   :  { %2159 = vpow2.f32 %v1946_v43  ;;  %v1350_v14 = vor.u32 1.1754944e-38, %v1349_v47  ;;  %vm1348_vm3 = vcmp.eq.f32.partialorder %v1347_v49, 8.507059e+37 }
 0xf22   :  { %v2156_v41 = vpop.eup %2155 }
 0xf23   :  { %v1339_v42 = vmul.f32 %v2156_v41, %v1336_v53  ;;  %v2158_v0 = vpop.eup %2157  ;;  %vm1344_vm0 = vweird.f32 %v2156_v41 }
 0xf24   :  { %v1337_v46 = vadd.f32 1.0, %v2158_v0  ;;  %v2160_v62 = vpop.eup %2159  ;;  %vm1345_vm2 = vmor %vm1343_vm1, %vm1344_vm0 }
 0xf25   :  { %v1340_v44 = vsub.f32 1.0, %v1339_v42  ;;  %v1447_v52 = vadd.f32 1.0, %v2160_v62 }
 0xf26   :  { %2161 = vrcp.f32 %v1337_v46  ;;  %v1364_v13 = vand.u32 2147483648, %v1337_v46  ;;  %vm1358_vm5 = vweird.f32 %v1337_v46  ;;  %v1362_v9 = vand.u32 2147483647, %v1337_v46 }
 0xf27   :  { %v1341_v45 = vmul.f32 %v2156_v41, %v1340_v44  ;;  %2163 = vrcp.f32 %v1447_v52  ;;  %v1459_v11 = vand.u32 2147483648, %v1447_v52  ;;  %vm1453_vm9 = vweird.f32 %v1447_v52 }
 0xf28   :  { %v1365_v12 = vor.u32 1.1754944e-38, %v1364_v13  ;;  %vm1363_vm8 = vcmp.eq.f32.partialorder %v1362_v9, 8.507059e+37  ;;  %v1457_v20 = vand.u32 2147483647, %v1447_v52 }
 0xf29   :  { %v1342_v8 = vadd.f32 %v2156_v41, %v1341_v45  ;;  %v1460_v24 = vor.u32 1.1754944e-38, %v1459_v11 }
 0xf2a   :  { %vm1458_vm13 = vcmp.eq.f32.partialorder %v1457_v20, 8.507059e+37 }
 0xf2b   :  { %v1346_v51 = vsel %vm1345_vm2, %v2156_v41, %v1342_v8 }
 0xf2c   :  { %v1351_v55 = vsel %vm1348_vm3, %v1350_v14, %v1346_v51  ;;  %v2162_v59 = vpop.eup %2161 }
 0xf2d   :  { %v1354_v60 = vmul.f32 %v2162_v59, %v1337_v46  ;;  %v2164_v61 = vpop.eup %2163  ;;  %vm1359_vm4 = vweird.f32 %v2162_v59  ;;  %v1376_v1 = vmul.f32 %v1372_v27, %v1351_v55 }
 0xf2e   :  { %v1449_v4 = vmul.f32 %v2164_v61, %v1447_v52  ;;  %vm1360_vm6 = vmor %vm1358_vm5, %vm1359_vm4  ;;  %vm1454_vm7 = vweird.f32 %v2164_v61 }
 0xf2f   :  { %v1355_v29 = vsub.f32 1.0, %v1354_v60  ;;  %vm1455_vm12 = vmor %vm1453_vm9, %vm1454_vm7 }
 0xf30   :  { %v1450_v25 = vsub.f32 1.0, %v1449_v4 }
 0xf31   :  { %v1356_v28 = vmul.f32 %v2162_v59, %v1355_v29 }
 0xf32   :  { %v1451_v6 = vmul.f32 %v2164_v61, %v1450_v25 }
 0xf33   :  { %v1357_v5 = vadd.f32 %v2162_v59, %v1356_v28 }
 0xf34   :  { %v1452_v15 = vadd.f32 %v2164_v61, %v1451_v6 }
 0xf35   :  { %v1361_v10 = vsel %vm1360_vm6, %v2162_v59, %v1357_v5 }
 0xf36   :  { %v1366_v18 = vsel %vm1363_vm8, %v1365_v12, %v1361_v10  ;;  %v1456_v23 = vsel %vm1455_vm12, %v2164_v61, %v1452_v15 }
 0xf37   :  { %v1461_v26 = vsel %vm1458_vm13, %v1460_v24, %v1456_v23  ;;  %v1377_v31 = vmul.f32 %v1373_v48, %v1366_v18 }
 0xf38   :  { %v1464_v35 = vmul.f32 %v1461_v26, %v2789_v7 }
 0xf6d   :  { %v1381_v56 = vpop.permute.xlu2 %1380 }
 0xf6e   :  { %v1386_v57 = vmul.f32 %v1381_v56, %v1351_v55 }
 0xf70   :  { %1390 = vrot.lane.b32.xlu2 %v1386_v57, %s2450_s11 }
 0xf86   :  { %v1383_v38 = vpop.permute.xlu0 %1382 }
 0xf87   :  { %v1387_v30 = vmul.f32 %v1383_v38, %v1366_v18 }
 0xf89   :  { %1392 = vrot.lane.b32.xlu0 %v1387_v30, %s2450_s11 }
 0xf8b   :  { %v1467_v16 = vpop.permute.xlu1 %1466 }
 0xf8c   :  { %v1469_v17 = vmul.f32 %v1467_v16, %v1461_v26 }
 0xf8e   :  { %1471 = vrot.lane.b32.xlu1 %v1469_v17, %s2450_s11 }
 0xfca   :  { %v1391_v50 = vpop.permute.xlu2 %1390 }
 0xfcb   :  { %v2819_v2 = vadd.f32 %v1391_v50, %v1376_v1 }
 0xfcd   :  { %2165 = vtanh.f32 %v2819_v2 }
 0xfd3   :  { %v2166_v33 = vpop.eup %2165 }
 0xfd4   :  { %1402 = vrot.lane.b32.xlu2 %v2166_v33, %s2437_s16 }
 0xffb   :  { %v1393_v32 = vpop.permute.xlu0 %1392 }
 0xffc   :  { %v2824_v34 = vadd.f32 %v1393_v32, %v1377_v31 }
 0xffe   :  { %2167 = vtanh.f32 %v2824_v34 }
0x1000   :  { %v1472_v63 = vpop.permute.xlu1 %1471 }
0x1001   :  { %v2828_v58 = vadd.f32 %v1472_v63, %v1464_v35 }
0x1003   :  { %2169 = vtanh.f32 %v2828_v58 }
0x1004   :  { %v2168_v36 = vpop.eup %2167 }
0x1005   :  { %1404 = vrot.lane.b32.xlu0 %v2168_v36, %s2437_s16 }
0x1009   :  { %v2170_v37 = vpop.eup %2169 }
0x100a   :  { %1477 = vrot.lane.b32.xlu1 %v2170_v37, %s2437_s16 }
0x102e   :  { %v1403_v3 = vpop.permute.xlu2 %1402 }
0x102f   :  { %v1408_v39 = vmul.f32 %v1403_v3, %v1351_v55 }
0x1031   :  { %v1481_v40 = vpack.c.bf16 %v1408_v39, %v1408_v39 }
0x1033   :  { %v1485_v21 = vunpack.c.l.b16 %v1481_v40 }
0x1035   :  { %v1487_v45 = vrot.slane %v1485_v21, 6 }
0x1077   :  { %v1405_v53 = vpop.permute.xlu0 %1404 }
0x1078   :  { %v1409_v41 = vmul.f32 %v1405_v53, %v1366_v18 }
0x107a   :  { %v1482_v42 = vpack.c.bf16 %v1409_v41, %v1409_v41 }
0x107c   :  { %v1486_v43 = vunpack.c.l.b16 %v1482_v42  ;;  %v1478_v7 = vpop.permute.xlu1 %1477 }
0x107d   :  { %v1480_v44 = vmul.f32 %v1478_v7, %v1461_v26 }
0x107e   :  { %v1488_v0 = vrot.slane %v1486_v43, 5 }
0x107f   :  { %v1609_v46 = vpack.c.bf16 %v1480_v44, %v1480_v44 }
0x1080   :  { %v1489_v8 = vsel %vm354_vm10, %v1488_v0, %v1487_v45 }
0x1081   :  { %1611 = vrot.lane.b32.xlu0 %v1609_v46, %s2450_s11  ;;  %v1490_v47 = vpack.c.b16 %v1489_v8, %v1489_v8 }
0x1083   :  { %1491 = vrot.lane.b32.xlu2 %v1490_v47, %s2450_s11 }
0x10dd   :  { %v1492_v62 = vpop.permute.xlu2 %1491 }
0x10de   :  { %1947 = vmatmul.msk.bf16.vlgmr.msrb.gmra.mxu0 %vm250_vm11, %v1492_v62  ;;  %1950 = vmatmul.msk.bf16.vlgmr.msrb.gmra.mxu1 %vm250_vm11, %v1492_v62 }
0x10f3   :  { %v1612_v49 = vpop.permute.xlu0 %1611 }
0x10f4   :  { %1951 = vmatmul.msk.bf16.vlgmr.msrb.gmra.mxu2 %vm250_vm11, %v1612_v49 }
0x115b   :  { %v1505_v51 = vpop.f32.mrf.mxu0  ;;  %v1605_v52 = vpop.f32.mrf.mxu1 }
0x115c   :  { %v1510_v14 = vrot.slane %v1505_v51, 1  ;;  %v1511_v55 = vrot.slane %v1505_v51, 2  ;;  %v1606_v4 = vadd.f32 %v2777_v54, %v1605_v52  ;;  %v1559_v51 = vrot.slane %v2824_v34, 7 }
0x115e   :  { %v1514_v56 = vadd.f32 %v1510_v14, %v2583_v22  ;;  %v1515_v57 = vadd.f32 %v1511_v55, %v2580_v19 }
0x1160   :  { %2171 = vtanh.f32 %v1514_v56  ;;  %v1949_v19 = vmul.f32 -1.442695, %v1515_v57  ;;  %v1948_v10 = vmul.f32 -1.442695, %v1514_v56 }
0x1161   :  { %2173 = vtanh.f32 %v1515_v57  ;;  %v1558_v57 = vrot.slane %v2819_v2, 7 }
0x1163   :  { %v1507_v59 = vpop.f32.mrf.mxu0  ;;  %v1607_v60 = vpop.f32.mrf.mxu1 }
0x1166   :  { %v2172_v61 = vpop.eup %2171 }
0x1167   :  { %v2174_v29 = vpop.eup %2173  ;;  %1566 = vrot.lane.b32.xlu1 %v2172_v61, %s2437_s16 }
0x1168   :  { %1568 = vrot.lane.b32.xlu2 %v2174_v29, %s2437_s16 }
0x1177   :  { %v1625_v28 = vpop.f32.mrf.mxu2 }
0x1178   :  { %v1629_v25 = vadd.f32 %v1625_v28, %v1606_v4 }
0x117a   :  { %2175 = vtanh.f32 %v1629_v25  ;;  %v1952_v50 = vmul.f32 -1.442695, %v1629_v25 }
0x117b   :  { %2177 = vpow2.f32 %v1949_v19 }
0x117f   :  { %v1627_v5 = vpop.f32.mrf.mxu2 }
0x1180   :  { %v2176_v13 = vpop.eup %2175 }
0x1181   :  { %1652 = vrot.lane.b32.xlu0 %v2176_v13, %s2437_s16  ;;  %v2178_v22 = vpop.eup %2177 }
0x1182   :  { %v1523_v6 = vadd.f32 1.0, %v2178_v22 }
0x1184   :  { %2179 = vrcp.f32 %v1523_v6  ;;  %v1550_v30 = vand.u32 2147483648, %v1523_v6  ;;  %vm1544_vm15 = vweird.f32 %v1523_v6  ;;  %v1548_v23 = vand.u32 2147483647, %v1523_v6 }
0x1185   :  { %2181 = vpow2.f32 %v1948_v10 }
0x1186   :  { %v1551_v16 = vor.u32 1.1754944e-38, %v1550_v30  ;;  %vm1549_vm1 = vcmp.eq.f32.partialorder %v1548_v23, 8.507059e+37 }
0x118a   :  { %v2180_v9 = vpop.eup %2179 }
0x118b   :  { %v1540_v12 = vmul.f32 %v2180_v9, %v1523_v6  ;;  %v2182_v11 = vpop.eup %2181  ;;  %vm1545_vm14 = vweird.f32 %v2180_v9 }
0x118c   :  { %v1522_v18 = vadd.f32 1.0, %v2182_v11  ;;  %vm1546_vm0 = vmor %vm1544_vm15, %vm1545_vm14  ;;  %vm1853_vm15 = vcmask 1043456  }
0x118d   :  { %v1541_v15 = vsub.f32 1.0, %v1540_v12 }
0x118e   :  { %2183 = vrcp.f32 %v1522_v18  ;;  %v1535_v36 = vand.u32 2147483648, %v1522_v18  ;;  %vm1529_vm3 = vweird.f32 %v1522_v18  ;;  %v1533_v37 = vand.u32 2147483647, %v1522_v18 }
0x118f   :  { %v1542_v38 = vmul.f32 %v2180_v9, %v1541_v15  ;;  %2185 = vpow2.f32 %v1952_v50 }
0x1190   :  { %v1536_v39 = vor.u32 1.1754944e-38, %v1535_v36  ;;  %vm1534_vm5 = vcmp.eq.f32.partialorder %v1533_v37, 8.507059e+37 }
0x1191   :  { %v1543_v20 = vadd.f32 %v2180_v9, %v1542_v38 }
0x1193   :  { %v1547_v24 = vsel %vm1546_vm0, %v2180_v9, %v1543_v20  ;;  %vm1849_vm0 = vcmask 195584  }
0x1194   :  { %v2845_v17 = vsel %vm1549_vm1, %v1551_v16, %v1547_v24  ;;  %v2184_v27 = vpop.eup %2183  ;;  %vm1870_vm1 = vcmask 254976  }
0x1195   :  { %v1525_v33 = vmul.f32 %v2184_v27, %v1522_v18  ;;  %v2186_v32 = vpop.eup %2185  ;;  %vm1530_vm2 = vweird.f32 %v2184_v27  ;;  %v1563_v52 = vmul.f32 %v1559_v51, %v2845_v17 }
0x1196   :  { %v1633_v63 = vadd.f32 1.0, %v2186_v32  ;;  %vm1531_vm4 = vmor %vm1529_vm3, %vm1530_vm2 }
0x1197   :  { %v1526_v48 = vsub.f32 1.0, %v1525_v33 }
0x1198   :  { %2187 = vrcp.f32 %v1633_v63  ;;  %v1645_v45 = vand.u32 2147483648, %v1633_v63  ;;  %vm1639_vm7 = vweird.f32 %v1633_v63  ;;  %v1643_v0 = vand.u32 2147483647, %v1633_v63 }
0x1199   :  { %v1527_v31 = vmul.f32 %v2184_v27, %v1526_v48 }
0x119a   :  { %v1646_v8 = vor.u32 1.1754944e-38, %v1645_v45  ;;  %vm1644_vm9 = vcmp.eq.f32.partialorder %v1643_v0, 8.507059e+37  ;;  %v1987_v45 = vld [vmem:[#allocation12 + $0x8] sm:$0xff]  ;;  %v1986_v0 = vld [vmem:[#allocation12] sm:$0xff] }
0x119b   :  { %v1528_v35 = vadd.f32 %v2184_v27, %v1527_v31  ;;  %1786 = vmatpush.bf16.msra.mxu1 %v1987_v45 }
0x119d   :  { %v1532_v3 = vsel %vm1531_vm4, %v2184_v27, %v1528_v35 }
0x119e   :  { %v1537_v53 = vsel %vm1534_vm5, %v1536_v39, %v1532_v3  ;;  %v2188_v21 = vpop.eup %2187 }
0x119f   :  { %v1635_v42 = vmul.f32 %v2188_v21, %v1633_v63  ;;  %vm1640_vm6 = vweird.f32 %v2188_v21  ;;  %v1562_v59 = vmul.f32 %v1558_v57, %v1537_v53  ;;  %1787 = vmatpush.bf16.msra.mxu1 %v1986_v0  ;;  %v1990_v57 = vld [vmem:[#allocation15] sm:$0xff] }
0x11a0   :  { %vm1641_vm8 = vmor %vm1639_vm7, %vm1640_vm6 }
0x11a1   :  { %v1636_v43 = vsub.f32 1.0, %v1635_v42 }
0x11a3   :  { %v1637_v7 = vmul.f32 %v2188_v21, %v1636_v43 }
0x11a5   :  { %v1638_v44 = vadd.f32 %v2188_v21, %v1637_v7 }
0x11a7   :  { %v1642_v46 = vsel %vm1641_vm8, %v2188_v21, %v1638_v44 }
0x11a8   :  { %v1647_v62 = vsel %vm1644_vm9, %v1646_v8, %v1642_v46 }
0x11a9   :  { %v1650_v4 = vmul.f32 %v1647_v62, %v2828_v58 }
0x11c2   :  { %v1569_v26 = vpop.permute.xlu2 %1568 }
0x11c3   :  { %v1573_v1 = vmul.f32 %v1569_v26, %v2845_v17 }
0x11c5   :  { %1578 = vrot.lane.b32.xlu2 %v1573_v1, %s2450_s11 }
0x11d9   :  { %v1567_v40 = vpop.permute.xlu1 %1566 }
0x11da   :  { %v1572_v41 = vmul.f32 %v1567_v40, %v1537_v53 }
0x11dc   :  { %1576 = vrot.lane.b32.xlu1 %v1572_v41, %s2450_s11 }
0x11f3   :  { %v1653_v47 = vpop.permute.xlu0 %1652 }
0x11f4   :  { %v1655_v49 = vmul.f32 %v1653_v47, %v1647_v62 }
0x11f6   :  { %1657 = vrot.lane.b32.xlu0 %v1655_v49, %s2450_s11  ;;  %v1988_v49 = vld [vmem:[#allocation13] sm:$0xff] }
0x121f   :  { %v1579_v14 = vpop.permute.xlu2 %1578 }
0x1220   :  { %v1583_v55 = vadd.f32 %v1579_v14, %v1563_v52  ;;  %v1835_v52 = vld [vmem:[#allocation15 + $0x8] sm:$0xf] }
0x1221   :  { %v1845_v14 = vunpack.c.l.b16 %v1835_v52 }
0x1222   :  { %2189 = vtanh.f32 %v1583_v55 }
0x1223   :  { %v1847_v55 = vpack.c.b16 %v1845_v14, %v1845_v14 }
0x1228   :  { %v2190_v56 = vpop.eup %2189 }
0x1229   :  { %1590 = vrot.lane.b32.xlu2 %v2190_v56, %s2437_s16  ;;  %v1855_v56 = vsel %vm1853_vm15, %v1847_v55, 0 }
0x122a   :  { %1863 = vmatpush.bf16.msra.mxu3 %v1855_v56 }
0x122e   :  { %1864 = vmatpush.bf16.msra.mxu3 %v1990_v57 }
0x124e   :  { %v1577_v60 = vpop.permute.xlu1 %1576 }
0x124f   :  { %v1582_v61 = vadd.f32 %v1577_v60, %v1562_v59  ;;  %v2008_v59 = vld [vmem:[%s2891_s8] ss:$0 sm:$0xff] }
0x1251   :  { %2191 = vtanh.f32 %v1582_v61 }
0x1257   :  { %v2192_v29 = vpop.eup %2191 }
0x1258   :  { %1588 = vrot.lane.b32.xlu1 %v2192_v29, %s2437_s16 }
0x1268   :  { %v1658_v34 = vpop.permute.xlu0 %1657 }
0x1269   :  { %v1660_v28 = vadd.f32 %v1658_v34, %v1650_v4 }
0x126b   :  { %2193 = vtanh.f32 %v1660_v28 }
0x1271   :  { %v2194_v25 = vpop.eup %2193 }
0x1272   :  { %1663 = vrot.lane.b32.xlu0 %v2194_v25, %s2437_s16 }
0x1283   :  { %v1591_v5 = vpop.permute.xlu2 %1590 }
0x1284   :  { %v1595_v13 = vmul.f32 %v1591_v5, %v2845_v17 }
0x1286   :  { %v1668_v19 = vpack.c.bf16 %v1595_v13, %v1595_v13 }
0x1288   :  { %v1672_v6 = vunpack.c.l.b16 %v1668_v19 }
0x128a   :  { %v1674_v12 = vrot.slane %v1672_v6, 6 }
0x12ca   :  { %v1589_v2 = vpop.permute.xlu1 %1588 }
0x12cb   :  { %v1594_v22 = vmul.f32 %v1589_v2, %v1537_v53 }
0x12cd   :  { %v1667_v9 = vpack.c.bf16 %v1594_v22, %v1594_v22  ;;  %v2010_v22 = vld [vmem:[%s2895_s12] ss:$0 sm:$0xff] }
0x12cf   :  { %v1671_v10 = vunpack.c.l.b16 %v1667_v9 }
0x12d1   :  { %v1673_v15 = vrot.slane %v1671_v10, 7 }
0x12d3   :  { %v1675_v11 = vsel %vm354_vm10, %v1674_v12, %v1673_v15 }
0x12d4   :  { %v1676_v58 = vpack.c.b16 %v1675_v11, %v1675_v11 }
0x12d6   :  { %1677 = vrot.lane.b32.xlu1 %v1676_v58, %s2450_s11 }
0x12e4   :  { %v1664_v38 = vpop.permute.xlu0 %1663 }
0x12e5   :  { %v1666_v18 = vmul.f32 %v1664_v38, %v1647_v62  ;;  %v1989_v62 = vld [vmem:[#allocation13 + $0x8] sm:$0xff] }
0x12e6   :  { %1824 = vmatpush.bf16.msra.mxu2 %v1989_v62 }
0x12e7   :  { %v1695_v20 = vpack.c.bf16 %v1666_v18, %v1666_v18 }
0x12e9   :  { %1697 = vrot.lane.b32.xlu2 %v1695_v20, %s2450_s11 }
0x12ea   :  { %1825 = vmatpush.bf16.msra.mxu2 %v1988_v49 }
0x1343   :  { %v1698_v30 = vpop.permute.xlu2 %1697 }
0x1344   :  { %1954 = vmatmul.msk.bf16.vlgmr.msra.gmra.mxu0 %vm250_vm11, %v1698_v30 }
0x1348   :  { %v1678_v23 = vpop.permute.xlu1 %1677 }
0x1349   :  { %1953 = vmatmul.msk.bf16.vlgmr.msrb.gmra.mxu3 %vm250_vm11, %v1678_v23 }
0x13c1   :  { %v1711_v24 = vpop.f32.mrf.mxu0 }
0x13c9   :  { %v1713_v16 = vpop.f32.mrf.mxu0 }
0x13cc   :  { %v1691_v26 = vpop.f32.mrf.mxu3 }
0x13cd   :  { %v1692_v17 = vadd.f32 %v2777_v54, %v1691_v26 }
0x13cf   :  { %v1715_v27 = vadd.f32 %v1711_v24, %v1692_v17 }
0x13d1   :  { %2195 = vtanh.f32 %v1715_v27  ;;  %v1955_v33 = vmul.f32 -1.442695, %v1715_v27 }
0x13d3   :  { %2197 = vpow2.f32 %v1955_v33 }
0x13d4   :  { %v1693_v1 = vpop.f32.mrf.mxu3 }
0x13d7   :  { %v2196_v50 = vpop.eup %2195 }
0x13d8   :  { %1738 = vrot.lane.b32.xlu0 %v2196_v50, %s2437_s16 }
0x13d9   :  { %v2198_v48 = vpop.eup %2197 }
0x13da   :  { %v1719_v31 = vadd.f32 1.0, %v2198_v48 }
0x13dc   :  { %2199 = vrcp.f32 %v1719_v31  ;;  %v1731_v3 = vand.u32 2147483648, %v1719_v31  ;;  %vm1725_vm12 = vweird.f32 %v1719_v31  ;;  %v1729_v54 = vand.u32 2147483647, %v1719_v31 }
0x13de   :  { %v1732_v40 = vor.u32 1.1754944e-38, %v1731_v3  ;;  %vm1730_vm14 = vcmp.eq.f32.partialorder %v1729_v54, 8.507059e+37 }
0x13e2   :  { %v2200_v32 = vpop.eup %2199 }
0x13e3   :  { %v1721_v35 = vmul.f32 %v2200_v32, %v1719_v31  ;;  %vm1726_vm10 = vweird.f32 %v2200_v32 }
0x13e4   :  { %vm1727_vm13 = vmor %vm1725_vm12, %vm1726_vm10 }
0x13e5   :  { %v1722_v63 = vsub.f32 1.0, %v1721_v35 }
0x13e7   :  { %v1723_v36 = vmul.f32 %v2200_v32, %v1722_v63 }
0x13e9   :  { %v1724_v37 = vadd.f32 %v2200_v32, %v1723_v36 }
0x13eb   :  { %v1728_v39 = vsel %vm1727_vm13, %v2200_v32, %v1724_v37 }
0x13ec   :  { %v1733_v41 = vsel %vm1730_vm14, %v1732_v40, %v1728_v39 }
0x13ed   :  { %v1736_v42 = vmul.f32 %v1733_v41, %v1660_v28  ;;  %v2009_v28 = vld [vmem:[%s2893_s10] ss:$0 sm:$0xff] }
0x144a   :  { %v1739_v53 = vpop.permute.xlu0 %1738 }
0x144b   :  { %v1741_v21 = vmul.f32 %v1739_v53, %v1733_v41 }
0x144d   :  { %1743 = vrot.lane.b32.xlu1 %v1741_v21, %s2450_s11 }
0x14bf   :  { %v1744_v43 = vpop.permute.xlu1 %1743 }
0x14c0   :  { %v1746_v7 = vadd.f32 %v1744_v43, %v1736_v42 }
0x14c2   :  { %2201 = vtanh.f32 %v1746_v7 }
0x14c8   :  { %v2202_v44 = vpop.eup %2201 }
0x14c9   :  { %1749 = vrot.lane.b32.xlu2 %v2202_v44, %s2437_s16 }
0x1523   :  { %v1750_v46 = vpop.permute.xlu2 %1749 }
0x1524   :  { %v1752_v8 = vmul.f32 %v1750_v46, %v1733_v41 }
0x1526   :  { %v1753_v47 = vpack.c.bf16 %v1752_v8, %v1752_v8 }
0x1528   :  { %1763 = vrot.lane.b32.xlu0 %v1753_v47, %s2450_s11 }
0x159a   :  { %v1764_v51 = vpop.permute.xlu0 %1763 }
0x159b   :  { %1964 = vmatmul.msk.bf16.vlgmr.msra.gmra.mxu1 %vm250_vm11, %v1764_v51 }
0x1618   :  { %v1789_v60 = vpop.f32.mrf.mxu1 }
0x1619   :  { %v1790_v61 = vadd.f32 %v2008_v59, %v1789_v60 }
0x161b   :  { %v1793_v29 = vmax.f32 %v1790_v61, 0.0 }
0x161d   :  { %v1794_v4 = vpack.c.bf16 %v1793_v29, %v1793_v29 }
0x161f   :  { %1973 = vmatmul.msk.bf16.vlgmr.msra.gmra.mxu2 %vm250_vm11, %v1794_v4 }
0x1620   :  { %v1791_v34 = vpop.f32.mrf.mxu1 }
0x16a2   :  { %v1827_v25 = vpop.f32.mrf.mxu2 }
0x16a3   :  { %v1828_v5 = vadd.f32 %v2009_v28, %v1827_v25 }
0x16a5   :  { %v1831_v13 = vmax.f32 %v1828_v5, 0.0 }
0x16a7   :  { %v1832_v19 = vpack.c.bf16 %v1831_v13, %v1831_v13 }
0x16a9   :  { %1978 = vmatmul.msk.bf16.vlgmr.msra.gmra.mxu3 %vm1849_vm0, %v1832_v19 }
0x16aa   :  { %v1829_v2 = vpop.f32.mrf.mxu2 }
0x172c   :  { %v1866_v6 = vpop.f32.mrf.mxu3 }
0x172d   :  { %v1867_v9 = vadd.f32 %v2010_v22, %v1866_v6 }
0x172f   :  { %1871 = vst.msk [vmem:[%s2896_s13] sm:$0x3] %vm1870_vm1, %v1867_v9 }
0x1734   :  { %v1868_v10 = vpop.f32.mrf.mxu3 }
0x1735   :  { %1876 = vsyncpa [#allocation3], 1 }
0x1736   :  { %1877 = vsyncpa [#allocation5], 1 }
0x1737   :  { %1878 = vsyncpa [#allocation8], 1 }
0x1738   :  { %1879 = vsyncpa [#allocation11], 1 }
0x1739   :  { %1880 = vsyncpa [#allocation14], 1 }

</bundles_post_ra>
